<compile_context>
chip_gen: v7x
topology: tpu7x:2x2x1
jax: 0.10.0
libtpu: 0.0.40
codegen_flags: <defaults>
</compile_context>

<pallas_src>
import math

import jax
import jax.numpy as jnp
from jax.experimental import pallas as pl
from jax.experimental.pallas import tpu as pltpu


# --------------------------------------------------------------------------
# Kernels
# --------------------------------------------------------------------------
def _ngpt_mlp_kernel_acc(x_ref, wup_ref, wdown_ref, o_ref, acc_ref):
    """Variant with a separate f32 accumulator (used when output is not f32).

    x_ref    : (tm, H)       current token tile, full hidden dim
    wup_ref  : (H, ti)       up-proj slice (suv gate already folded in)
    wdown_ref: (ti, H)       down-proj slice
    o_ref    : (tm, H)       output tile (resident across the j axis)
    acc_ref  : (tm, H) f32   accumulator scratch
    """
    j = pl.program_id(1)

    @pl.when(j == 0)
    def _():
        acc_ref[...] = jnp.zeros_like(acc_ref)

    # up projection for this intermediate slice (f32 accumulation on the MXU)
    up = jnp.dot(x_ref[...], wup_ref[...], preferred_element_type=jnp.float32)
    # SiLU in f32 (suv gate is pre-folded into wup)
    h = up * jax.nn.sigmoid(up)
    # partial down projection, accumulate over intermediate tiles
    acc_ref[...] += jnp.dot(h.astype(wdown_ref.dtype), wdown_ref[...],
                            preferred_element_type=jnp.float32)

    @pl.when(j == pl.num_programs(1) - 1)
    def _():
        o_ref[...] = acc_ref[...].astype(o_ref.dtype)


def _ngpt_mlp_kernel_f32out(x_ref, wup_ref, wdown_ref, o_ref):
    """Variant for f32 output: accumulate directly into the resident o_ref."""
    j = pl.program_id(1)

    @pl.when(j == 0)
    def _():
        o_ref[...] = jnp.zeros_like(o_ref)

    up = jnp.dot(x_ref[...], wup_ref[...], preferred_element_type=jnp.float32)
    h = up * jax.nn.sigmoid(up)
    o_ref[...] += jnp.dot(h.astype(wdown_ref.dtype), wdown_ref[...],
                          preferred_element_type=jnp.float32)


# --------------------------------------------------------------------------
# Wrapper
# --------------------------------------------------------------------------
def _pick_tile(requested, total, multiple):
    """Largest tile <= requested that is a multiple of `multiple` and divides total."""
    t = min(requested, total)
    t = max(multiple, (t // multiple) * multiple)
    while total % t != 0:
        t -= multiple
    assert t >= multiple and total % t == 0, (requested, total, multiple)
    return t


def _vmem_limit_bytes(tm, ti, H, in_dtype, out_dtype, use_acc):
    ib = jnp.dtype(in_dtype).itemsize
    ob = jnp.dtype(out_dtype).itemsize
    # double-buffered inputs + output, plus optional f32 accumulator scratch
    buffered = 2 * (tm * H * ib + H * ti * ib + ti * H * ib) + 2 * tm * H * ob
    scratch = tm * H * 4 if use_acc else 0
    limit = int((buffered + scratch) * 1.2)
    # floor well above small-shape needs; cap at v7x physical VMEM (64 MiB)
    return min(max(limit, 16 * 2**20), 64 * 2**20)


def ngpt_mlp(x, w_up_scaled, w_down, *, tm=256, ti=512, out_dtype=None):
    """x: (S, H); w_up_scaled: (H, I) with suv folded in; w_down: (I, H)."""
    S, H = x.shape
    H2, I = w_up_scaled.shape
    assert H2 == H and w_down.shape == (I, H)
    out_dtype = jnp.dtype(out_dtype) if out_dtype is not None else x.dtype

    # bf16 activations pack 16 rows per sublane group -> tm multiple of 16.
    row_multiple = 16 if x.dtype == jnp.bfloat16 else 8
    tm = _pick_tile(tm, S, row_multiple)
    ti = _pick_tile(ti, I, 128)

    use_acc = out_dtype != jnp.float32
    kernel = _ngpt_mlp_kernel_acc if use_acc else _ngpt_mlp_kernel_f32out
    scratch_shapes = [pltpu.VMEM((tm, H), jnp.float32)] if use_acc else []

    grid = (S // tm, I // ti)

    return pl.pallas_call(
        kernel,
        out_shape=jax.ShapeDtypeStruct((S, H), out_dtype),
        grid_spec=pltpu.PrefetchScalarGridSpec(
            num_scalar_prefetch=0,
            grid=grid,
            in_specs=[
                pl.BlockSpec((tm, H), lambda i, j: (i, 0)),   # x
                pl.BlockSpec((H, ti), lambda i, j: (0, j)),   # w_up (suv folded)
                pl.BlockSpec((ti, H), lambda i, j: (j, 0)),   # w_down
            ],
            out_specs=pl.BlockSpec((tm, H), lambda i, j: (i, 0)),
            scratch_shapes=scratch_shapes,
        ),
        compiler_params=pltpu.CompilerParams(
            dimension_semantics=("parallel", "arbitrary"),
            vmem_limit_bytes=_vmem_limit_bytes(tm, ti, H, x.dtype, out_dtype,
                                               use_acc),
        ),
    )(x, w_up_scaled, w_down)


# --------------------------------------------------------------------------
# One-time weight preparation (fold the suv gate into w_up, cast dtypes)
# --------------------------------------------------------------------------
def prepare_ngpt_mlp_weights(w_up, w_down, suv_weight, hidden_size,
                             suv_init_value, suv_init_scaling,
                             dtype=jnp.bfloat16):
    """w_up: (H, I), w_down: (I, H), suv_weight: PyTorch (I, 1) layout.

    suv = (ones(1,1) @ W_suv.T) * (suv_init_value / suv_init_scaling * sqrt(H))
    and silu(suv * (x @ W_up)) == silu(x @ (W_up * suv)) since suv is a
    per-output-column scale, so it is folded into W_up once here.
    """
    suv = suv_weight.reshape(1, -1).astype(jnp.float32) * (
        suv_init_value / suv_init_scaling * math.sqrt(hidden_size))
    w_up_scaled = (w_up.astype(jnp.float32) * suv).astype(dtype)
    return w_up_scaled, w_down.astype(dtype)


# --------------------------------------------------------------------------
# Reference (mirrors the kernel's precision choices)
# --------------------------------------------------------------------------
def ngpt_mlp_reference(x, w_up_scaled, w_down):
    up = jnp.dot(x, w_up_scaled, preferred_element_type=jnp.float32)
    h = up * jax.nn.sigmoid(up)
    return jnp.dot(h.astype(w_down.dtype), w_down,
                   preferred_element_type=jnp.float32)


if __name__ == "__main__":
    # Small, TPU-tile-friendly shapes.
    seq = 256
    hidden_size = 256
    intermediate_size = 512
    suv_init_value = 1.0
    suv_init_scaling = 1.0

    key = jax.random.PRNGKey(0)
    kx, ku, kd = jax.random.split(key, 3)

    x_f32 = jax.random.normal(kx, (seq, hidden_size), dtype=jnp.float32)
    # Weights pre-transposed to (in, out) layout.
    w_up = jax.random.normal(ku, (hidden_size, intermediate_size),
                             dtype=jnp.float32) * 0.02
    w_down = jax.random.normal(kd, (intermediate_size, hidden_size),
                               dtype=jnp.float32) * 0.02
    # PyTorch suv ColumnParallelLinear weight has shape (I, 1), constant-init.
    suv_weight = jnp.full((intermediate_size, 1), suv_init_scaling,
                          dtype=jnp.float32)

    # ---- f32 path (exercises the no-scratch, accumulate-into-output kernel) ----
    w_up_f32, w_down_f32 = prepare_ngpt_mlp_weights(
        w_up, w_down, suv_weight, hidden_size,
        suv_init_value, suv_init_scaling, dtype=jnp.float32)
    out_f32 = jax.block_until_ready(ngpt_mlp(x_f32, w_up_f32, w_down_f32))
    ref_f32 = ngpt_mlp_reference(x_f32, w_up_f32, w_down_f32)
    assert jnp.allclose(out_f32, ref_f32, atol=1e-4, rtol=1e-4), \
        "f32 mismatch vs reference"

    # ---- bf16 matmul path (f32 accumulation, f32 scratch, bf16 output) ----
    w_up_bf, w_down_bf = prepare_ngpt_mlp_weights(
        w_up, w_down, suv_weight, hidden_size,
        suv_init_value, suv_init_scaling, dtype=jnp.bfloat16)
    x_bf = x_f32.astype(jnp.bfloat16)
    out_bf = jax.block_until_ready(
        ngpt_mlp(x_bf, w_up_bf, w_down_bf, out_dtype=jnp.bfloat16))
    ref_bf = ngpt_mlp_reference(x_bf, w_up_bf, w_down_bf)
    assert jnp.allclose(out_bf.astype(jnp.float32), ref_bf,
                        atol=3e-2, rtol=3e-2), "bf16 mismatch vs reference"

    print("KERNEL_OK")
</pallas_src>

<mosaic_0001>
module attributes {stable_mosaic.version = 11 : i64} {
  func.func @_ngpt_mlp_kernel_f32out(%arg0: i32, %arg1: i32, %arg2: memref<256x256xf32, #tpu.memory_space<vmem>>, %arg3: memref<256x512xf32, #tpu.memory_space<vmem>>, %arg4: memref<512x256xf32, #tpu.memory_space<vmem>>, %arg5: memref<256x256xf32, #tpu.memory_space<vmem>>) attributes {dimension_semantics = [#tpu.dimension_semantics<parallel>, #tpu.dimension_semantics<arbitrary>], iteration_bounds = array<i64: 1, 1>, scalar_prefetch = 0 : i64, scratch_operands = 0 : i64, tpu.core_type = #tpu.core_type<tc>, window_params = [{transform_indices = @transform_0, window_bounds = array<i64: 256, 256>}, {transform_indices = @transform_1, window_bounds = array<i64: 256, 512>}, {transform_indices = @transform_2, window_bounds = array<i64: 512, 256>}, {transform_indices = @transform_3, window_bounds = array<i64: 256, 256>}]} {
    %c0_i32 = arith.constant 0 : i32
    %0 = arith.cmpi eq, %arg1, %c0_i32 : i32
    %1 = arith.extui %0 : i1 to i32
    %c0_i32_0 = arith.constant 0 : i32
    %2 = arith.cmpi ne, %1, %c0_i32_0 : i32
    scf.if %2 {
      %cst_12 = arith.constant 0.000000e+00 : f32
      %17 = vector.broadcast %cst_12 : f32 to vector<256x256xf32>
      %c0_13 = arith.constant 0 : index
      %c0_14 = arith.constant 0 : index
      %18 = vector.load %arg5[%c0_13, %c0_14] : memref<256x256xf32, #tpu.memory_space<vmem>>, vector<256x256xf32>
      tpu.vector_store %arg5[%c0_13, %c0_14], %17 {strides = array<i32>} : memref<256x256xf32, #tpu.memory_space<vmem>>, vector<256x256xf32>,
    } else {
    }
    %c0 = arith.constant 0 : index
    %c0_1 = arith.constant 0 : index
    %3 = vector.load %arg2[%c0, %c0_1] : memref<256x256xf32, #tpu.memory_space<vmem>>, vector<256x256xf32>
    %c0_2 = arith.constant 0 : index
    %c0_3 = arith.constant 0 : index
    %4 = vector.load %arg3[%c0_2, %c0_3] : memref<256x512xf32, #tpu.memory_space<vmem>>, vector<256x512xf32>
    %cst = arith.constant dense<0.000000e+00> : vector<256x512xf32>
    %5 = tpu.matmul %3, %4, %cst {dimension_numbers = #tpu.dot_dimension_numbers<[1], [0], [0], [1], [0, 0, 1, 1], [], []>} : vector<256x256xf32>, vector<256x512xf32>, vector<256x512xf32> -> vector<256x512xf32>
    %6 = arith.negf %5 : vector<256x512xf32>
    %7 = math.exp %6 : vector<256x512xf32>
    %cst_4 = arith.constant 1.000000e+00 : f32
    %8 = vector.broadcast %cst_4 : f32 to vector<256x512xf32>
    %9 = arith.addf %8, %7 : vector<256x512xf32>
    %10 = arith.divf %8, %9 : vector<256x512xf32>
    %11 = arith.mulf %5, %10 : vector<256x512xf32>
    %c0_5 = arith.constant 0 : index
    %c0_6 = arith.constant 0 : index
    %12 = vector.load %arg5[%c0_5, %c0_6] : memref<256x256xf32, #tpu.memory_space<vmem>>, vector<256x256xf32>
    %c0_7 = arith.constant 0 : index
    %c0_8 = arith.constant 0 : index
    %13 = vector.load %arg4[%c0_7, %c0_8] : memref<512x256xf32, #tpu.memory_space<vmem>>, vector<512x256xf32>
    %cst_9 = arith.constant dense<0.000000e+00> : vector<256x256xf32>
    %14 = tpu.matmul %11, %13, %cst_9 {dimension_numbers = #tpu.dot_dimension_numbers<[1], [0], [0], [1], [0, 0, 1, 1], [], []>} : vector<256x512xf32>, vector<512x256xf32>, vector<256x256xf32> -> vector<256x256xf32>
    %15 = arith.addf %12, %14 : vector<256x256xf32>
    %c0_10 = arith.constant 0 : index
    %c0_11 = arith.constant 0 : index
    %16 = vector.load %arg5[%c0_10, %c0_11] : memref<256x256xf32, #tpu.memory_space<vmem>>, vector<256x256xf32>
    tpu.vector_store %arg5[%c0_10, %c0_11], %15 {strides = array<i32>} : memref<256x256xf32, #tpu.memory_space<vmem>>, vector<256x256xf32>,
    return
  }
  func.func @transform_0(%arg0: i32, %arg1: i32) -> (i32, i32) {
    %c0_i32 = arith.constant 0 : i32
    %c0_i32_0 = arith.constant 0 : i32
    return %arg0, %c0_i32 : i32, i32
  }
  func.func @transform_1(%arg0: i32, %arg1: i32) -> (i32, i32) {
    %c0_i32 = arith.constant 0 : i32
    %c0_i32_0 = arith.constant 0 : i32
    return %c0_i32, %arg1 : i32, i32
  }
  func.func @transform_2(%arg0: i32, %arg1: i32) -> (i32, i32) {
    %c0_i32 = arith.constant 0 : i32
    %c0_i32_0 = arith.constant 0 : i32
    return %arg1, %c0_i32 : i32, i32
  }
  func.func @transform_3(%arg0: i32, %arg1: i32) -> (i32, i32) {
    %c0_i32 = arith.constant 0 : i32
    %c0_i32_0 = arith.constant 0 : i32
    return %arg0, %c0_i32 : i32, i32
  }
}

</mosaic_0001>

<bundles_post_ra>
// kernel: tpu_custom_call.1
= control target key start
LH: loop header
LB: loop body
LE: loop exit
PB: predicated region body
PF: predicated region fallthrough
CT: control target
= control target key end

     0   :  { %8 = vsyncpa [#allocation3], 0  ;;  %s4494_s0 = inlined_call_operand.hbm [shape: f32[256,256], index: 0, kind: input, shape index: {}]   ;;  %s4495_s1 = inlined_call_operand.hbm [shape: f32[256,512], index: 1, kind: input, shape index: {}]   ;;  %s4496_s2 = inlined_call_operand.hbm [shape: f32[512,256], index: 2, kind: input, shape index: {}]   ;;  %s4497_s3 = inlined_call_operand.hbm [shape: f32[256,256], index: 3, kind: output, shape index: {}]  }
   0x1   :  { %9 = vsyncpa [#allocation6], 0 }
   0x2   :  { %10 = vsyncpa [#allocation4], 0  ;;  %s3641_s12 = smov [#allocation5]   ;;  %s3547_s16 = scalar_lea.hbm %s4495_s1, 16384 }
   0x3   :  { %s28_s13 = sshll.u32 %s3641_s12, 4  ;;  %p3548_p0 = scmp.ne.s32.totalorder %s4495_s1, %s3547_s16  ;;  %s29_s13 = int_to_ptr.vmem [resolvable:$true] %s28_s13 }
   0x4   :  { %p3551_p1 = scmp.lt.u32.totalorder %s3547_s16, %s4495_s1 }
   0x6   :  { %p3553_p2 = pnand %p3551_p1, %p3548_p0 }
   0x8   :  { %3556 = shalt.err (!%p3553_p2)
}
   0x9   :  { %s3557_s21 = scalar_lea.vmem %s29_s13, 16384  ;;  %p3562_p4 = scmp.lt.s32.totalorder %s29_s13, %s29_s13 }
   0xa   :  { %p3558_p3 = scmp.ne.s32.totalorder %s29_s13, %s3557_s21  ;;  %p3563_p5 = scmp.lt.s32.totalorder %s3557_s21, %s3557_s21 }
   0xc   :  { %p3564_p6 = por %p3563_p5, %p3562_p4 }
   0xe   :  { %p3565_p7 = pnand %p3564_p6, %p3558_p3 }
  0x10   :  { %3568 = shalt.err (!%p3565_p7)
}
  0x11   :  { %s3642_s22 = smov 512   ;;  %s3643_s23 = smov 32  }
  0x12   :  { %34 = dma.hbm_to_vmem [thread:$0]  %s4495_s1, 16384, %s29_s13, [#allocation6], %s3642_s22, %s3642_s22, %s3643_s23  }
  0x13   :  { %s3644_s26 = smov [#allocation2]   ;;  %s3569_s30 = scalar_lea.hbm %s4494_s0, 8192 }
  0x14   :  { %s16_s27 = sshll.u32 %s3644_s26, 4  ;;  %p3570_p8 = scmp.ne.s32.totalorder %s4494_s0, %s3569_s30  ;;  %s17_s27 = int_to_ptr.vmem [resolvable:$true] %s16_s27 }
  0x15   :  { %p3573_p9 = scmp.lt.u32.totalorder %s3569_s30, %s4494_s0 }
  0x17   :  { %p3575_p10 = pnand %p3573_p9, %p3570_p8 }
  0x19   :  { %3578 = shalt.err (!%p3575_p10)
}
  0x1a   :  { %s3579_s8 = scalar_lea.vmem %s17_s27, 8192  ;;  %p3584_p12 = scmp.lt.s32.totalorder %s17_s27, %s17_s27 }
  0x1b   :  { %p3580_p11 = scmp.ne.s32.totalorder %s17_s27, %s3579_s8  ;;  %p3585_p13 = scmp.lt.s32.totalorder %s3579_s8, %s3579_s8 }
  0x1d   :  { %p3586_p0 = por %p3585_p13, %p3584_p12 }
  0x1f   :  { %p3587_p1 = pnand %p3586_p0, %p3580_p11 }
  0x21   :  { %3590 = shalt.err (!%p3587_p1)
}
  0x22   :  { %s3645_s1 = smov 256   ;;  %s3646_s9 = smov 16  }
  0x23   :  { %22 = dma.hbm_to_vmem [thread:$0]  %s4494_s0, 8192, %s17_s27, [#allocation3], %s3645_s1, %s3645_s1, %s3646_s9  }
  0x24   :  { %s3647_s12 = smov [#allocation7]   ;;  %s3591_s16 = scalar_lea.hbm %s4496_s2, 16384 }
  0x25   :  { %s40_s13 = sshll.u32 %s3647_s12, 4  ;;  %p3592_p2 = scmp.ne.s32.totalorder %s4496_s2, %s3591_s16  ;;  %s41_s13 = int_to_ptr.vmem [resolvable:$true] %s40_s13 }
  0x26   :  { %p3595_p3 = scmp.lt.u32.totalorder %s3591_s16, %s4496_s2 }
  0x28   :  { %p3597_p4 = pnand %p3595_p3, %p3592_p2 }
  0x2a   :  { %3600 = shalt.err (!%p3597_p4)
}
  0x2b   :  { %s3601_s21 = scalar_lea.vmem %s41_s13, 16384  ;;  %p3606_p6 = scmp.lt.s32.totalorder %s41_s13, %s41_s13 }
  0x2c   :  { %p3602_p5 = scmp.ne.s32.totalorder %s41_s13, %s3601_s21  ;;  %p3607_p7 = scmp.lt.s32.totalorder %s3601_s21, %s3601_s21 }
  0x2e   :  { %p3608_p8 = por %p3607_p7, %p3606_p6 }
  0x30   :  { %p3609_p9 = pnand %p3608_p8, %p3602_p5 }
  0x32   :  { %3612 = shalt.err (!%p3609_p9)
}
  0x33   :  { %46 = dma.hbm_to_vmem [thread:$0]  %s4496_s2, 16384, %s41_s13, [#allocation6], %s3645_s1, %s3645_s1, %s3646_s9  }
  0x34   :  { %3635 = dma.done.wait [#allocation3], 8192  }
  0x35   :  { %3636 = vsyncadd [#allocation3], 4294959104 }
  0x36   :  { %3637 = dma.done.wait [#allocation6], 32768  }
  0x37   :  { %3638 = vsyncadd [#allocation6], 4294934528  ;;  %v189_v0 = vld [vmem:[#allocation5 + $0x8] sm:$0xff]  ;;  %v188_v2 = vld [vmem:[#allocation5] sm:$0xff]  ;;  %s3648_s2 = smov [#allocation8]  }
  0x38   :  { %v193_v1 = vld [vmem:[#allocation5 + $0x28] sm:$0xff]  ;;  %v192_v4 = vld [vmem:[#allocation5 + $0x20] sm:$0xff]  ;;  %s2565_s23 = sshll.u32 %s3648_s2, 4  ;;  %s2566_s23 = int_to_ptr.vmem [resolvable:$true] %s2565_s23 }
  0x39   :  { %v2706_v3 = vpack.c.bf16 %v193_v1, %v189_v0  ;;  %v197_v5 = vld [vmem:[#allocation5 + $0x48] sm:$0xff]  ;;  %v2708_v7 = vpack.c.bf16 %v192_v4, %v188_v2  ;;  %v196_v9 = vld [vmem:[#allocation5 + $0x40] sm:$0xff]  ;;  %s3613_s24 = scalar_lea.vmem %s2566_s23, 8192  ;;  %p3618_p11 = scmp.lt.s32.totalorder %s2566_s23, %s2566_s23 }
  0x3a   :  { %v201_v6 = vld [vmem:[#allocation5 + $0x68] sm:$0xff]  ;;  %v200_v10 = vld [vmem:[#allocation5 + $0x60] sm:$0xff]  ;;  %p3614_p10 = scmp.ne.s32.totalorder %s2566_s23, %s3613_s24  ;;  %p3619_p12 = scmp.lt.s32.totalorder %s3613_s24, %s3613_s24 }
  0x3b   :  { %v2710_v8 = vpack.c.bf16 %v201_v6, %v197_v5  ;;  %v205_v11 = vld [vmem:[#allocation5 + $0x88] sm:$0xff]  ;;  %2707 = vmatprep.subr.bf16.mxu1 %v2706_v3  ;;  %v2712_v13 = vpack.c.bf16 %v200_v10, %v196_v9  ;;  %v204_v15 = vld [vmem:[#allocation5 + $0x80] sm:$0xff] }
  0x3c   :  { %v209_v12 = vld [vmem:[#allocation5 + $0xa8] sm:$0xff]  ;;  %2709 = vmatpush1.bf16.msra.mxu1 %v2708_v7  ;;  %v208_v16 = vld [vmem:[#allocation5 + $0xa0] sm:$0xff]  ;;  %p3620_p13 = por %p3619_p12, %p3618_p11 }
  0x3d   :  { %2711 = vmatprep.subr.bf16.mxu1 %v2710_v8  ;;  %v2714_v14 = vpack.c.bf16 %v209_v12, %v205_v11  ;;  %v213_v17 = vld [vmem:[#allocation5 + $0xc8] sm:$0xff]  ;;  %v2716_v19 = vpack.c.bf16 %v208_v16, %v204_v15  ;;  %v212_v21 = vld [vmem:[#allocation5 + $0xc0] sm:$0xff] }
  0x3e   :  { %v217_v18 = vld [vmem:[#allocation5 + $0xe8] sm:$0xff]  ;;  %v216_v22 = vld [vmem:[#allocation5 + $0xe0] sm:$0xff]  ;;  %p3621_p0 = pnand %p3620_p13, %p3614_p10 }
  0x3f   :  { %v2718_v20 = vpack.c.bf16 %v217_v18, %v213_v17  ;;  %v221_v23 = vld [vmem:[#allocation5 + $0x108] sm:$0xff]  ;;  %v2720_v25 = vpack.c.bf16 %v216_v22, %v212_v21  ;;  %v220_v27 = vld [vmem:[#allocation5 + $0x100] sm:$0xff] }
  0x40   :  { %2713 = vmatpush1.bf16.msra.mxu1 %v2712_v13  ;;  %v225_v24 = vld [vmem:[#allocation5 + $0x128] sm:$0xff]  ;;  %v224_v28 = vld [vmem:[#allocation5 + $0x120] sm:$0xff] }
  0x41   :  { %2715 = vmatprep.subr.bf16.mxu1 %v2714_v14  ;;  %v2722_v26 = vpack.c.bf16 %v225_v24, %v221_v23  ;;  %v229_v29 = vld [vmem:[#allocation5 + $0x148] sm:$0xff]  ;;  %v2724_v31 = vpack.c.bf16 %v224_v28, %v220_v27  ;;  %v228_v33 = vld [vmem:[#allocation5 + $0x140] sm:$0xff] }
  0x42   :  { %v233_v30 = vld [vmem:[#allocation5 + $0x168] sm:$0xff]  ;;  %v232_v34 = vld [vmem:[#allocation5 + $0x160] sm:$0xff] }
  0x43   :  { %v2726_v32 = vpack.c.bf16 %v233_v30, %v229_v29  ;;  %v237_v35 = vld [vmem:[#allocation5 + $0x188] sm:$0xff]  ;;  %v2728_v37 = vpack.c.bf16 %v232_v34, %v228_v33  ;;  %v236_v39 = vld [vmem:[#allocation5 + $0x180] sm:$0xff]  ;;  %v195_v33 = vld [vmem:[#allocation5 + $0x38] sm:$0xff] }
  0x44   :  { %2717 = vmatpush1.bf16.msra.mxu1 %v2716_v19  ;;  %v241_v36 = vld [vmem:[#allocation5 + $0x1a8] sm:$0xff]  ;;  %v240_v40 = vld [vmem:[#allocation5 + $0x1a0] sm:$0xff] }
  0x45   :  { %2719 = vmatprep.subr.bf16.mxu1 %v2718_v20  ;;  %v2730_v38 = vpack.c.bf16 %v241_v36, %v237_v35  ;;  %v3711_v41 = vld [vmem:[#allocation2 + $0x8] sm:$0xff]  ;;  %v2732_v44 = vpack.c.bf16 %v240_v40, %v236_v39  ;;  %v244_v46 = vld [vmem:[#allocation5 + $0x1c0] sm:$0xff]  ;;  %v190_v36 = vld [vmem:[#allocation5 + $0x10] sm:$0xff] }
  0x46   :  { %v245_v42 = vld [vmem:[#allocation5 + $0x1c8] sm:$0xff]  ;;  %380 = vmatprep.mubr.f32.mxu1 %v3711_v41  ;;  %v248_v47 = vld [vmem:[#allocation5 + $0x1e0] sm:$0xff]  ;;  %v203_v39 = vld [vmem:[#allocation5 + $0x78] sm:$0xff] }
  0x47   :  { %v249_v43 = vld [vmem:[#allocation5 + $0x1e8] sm:$0xff]  ;;  %v2736_v50 = vpack.c.bf16 %v248_v47, %v244_v46  ;;  %v252_v52 = vld [vmem:[#allocation5 + $0x200] sm:$0xff]  ;;  %v202_v46 = vld [vmem:[#allocation5 + $0x70] sm:$0xff] }
  0x48   :  { %2721 = vmatpush1.bf16.msra.mxu1 %v2720_v25  ;;  %v2734_v45 = vpack.c.bf16 %v249_v43, %v245_v42  ;;  %v253_v48 = vld [vmem:[#allocation5 + $0x208] sm:$0xff]  ;;  %v256_v53 = vld [vmem:[#allocation5 + $0x220] sm:$0xff]  ;;  %v3716_v43 = vld [vmem:[#allocation2 + $0x18] sm:$0xff] }
  0x49   :  { %2723 = vmatprep.subr.bf16.mxu1 %v2722_v26  ;;  %v257_v49 = vld [vmem:[#allocation5 + $0x228] sm:$0xff]  ;;  %v2740_v56 = vpack.c.bf16 %v256_v53, %v252_v52  ;;  %v260_v58 = vld [vmem:[#allocation5 + $0x240] sm:$0xff]  ;;  %v207_v47 = vld [vmem:[#allocation5 + $0x98] sm:$0xff] }
  0x4a   :  { %v2738_v51 = vpack.c.bf16 %v257_v49, %v253_v48  ;;  %v261_v54 = vld [vmem:[#allocation5 + $0x248] sm:$0xff]  ;;  %v264_v59 = vld [vmem:[#allocation5 + $0x260] sm:$0xff]  ;;  %v211_v48 = vld [vmem:[#allocation5 + $0xb8] sm:$0xff] }
  0x4b   :  { %v265_v55 = vld [vmem:[#allocation5 + $0x268] sm:$0xff]  ;;  %v2744_v62 = vpack.c.bf16 %v264_v59, %v260_v58  ;;  %v268_v0 = vld [vmem:[#allocation5 + $0x280] sm:$0xff]  ;;  %v3720_v49 = vld [vmem:[#allocation2 + $0x10] sm:$0xff]  ;;  %v2778_v52 = vpack.c.bf16 %v211_v48, %v207_v47 }
  0x4c   :  { %2725 = vmatpush1.bf16.msra.mxu1 %v2724_v31  ;;  %v2742_v57 = vpack.c.bf16 %v265_v55, %v261_v54  ;;  %v269_v60 = vld [vmem:[#allocation5 + $0x288] sm:$0xff]  ;;  %v272_v1 = vld [vmem:[#allocation5 + $0x2a0] sm:$0xff]  ;;  %v206_v53 = vld [vmem:[#allocation5 + $0x90] sm:$0xff] }
  0x4d   :  { %2727 = vmatprep.subr.bf16.mxu1 %v2726_v32  ;;  %v273_v61 = vld [vmem:[#allocation5 + $0x2a8] sm:$0xff]  ;;  %v2748_v4 = vpack.c.bf16 %v272_v1, %v268_v0  ;;  %v276_v6 = vld [vmem:[#allocation5 + $0x2c0] sm:$0xff]  ;;  %v191_v32 = vld [vmem:[#allocation5 + $0x18] sm:$0xff] }
  0x4e   :  { %v2746_v63 = vpack.c.bf16 %v273_v61, %v269_v60  ;;  %v277_v2 = vld [vmem:[#allocation5 + $0x2c8] sm:$0xff]  ;;  %v280_v7 = vld [vmem:[#allocation5 + $0x2e0] sm:$0xff]  ;;  %v2770_v35 = vpack.c.bf16 %v195_v33, %v191_v32  ;;  %v210_v54 = vld [vmem:[#allocation5 + $0xb0] sm:$0xff] }
  0x4f   :  { %v281_v3 = vld [vmem:[#allocation5 + $0x2e8] sm:$0xff]  ;;  %v2752_v10 = vpack.c.bf16 %v280_v7, %v276_v6  ;;  %v284_v12 = vld [vmem:[#allocation5 + $0x300] sm:$0xff]  ;;  %v215_v55 = vld [vmem:[#allocation5 + $0xd8] sm:$0xff]  ;;  %v2780_v58 = vpack.c.bf16 %v210_v54, %v206_v53 }
  0x50   :  { %2729 = vmatpush1.bf16.msra.mxu1 %v2728_v37  ;;  %v2750_v5 = vpack.c.bf16 %v281_v3, %v277_v2  ;;  %v285_v8 = vld [vmem:[#allocation5 + $0x308] sm:$0xff]  ;;  %v288_v13 = vld [vmem:[#allocation5 + $0x320] sm:$0xff]  ;;  %v194_v37 = vld [vmem:[#allocation5 + $0x30] sm:$0xff] }
  0x51   :  { %2731 = vmatprep.subr.bf16.mxu1 %v2730_v38  ;;  %v289_v9 = vld [vmem:[#allocation5 + $0x328] sm:$0xff]  ;;  %v2756_v16 = vpack.c.bf16 %v288_v13, %v284_v12  ;;  %v292_v18 = vld [vmem:[#allocation5 + $0x340] sm:$0xff]  ;;  %v199_v38 = vld [vmem:[#allocation5 + $0x58] sm:$0xff]  ;;  %v2772_v42 = vpack.c.bf16 %v194_v37, %v190_v36 }
  0x52   :  { %v2754_v11 = vpack.c.bf16 %v289_v9, %v285_v8  ;;  %v293_v14 = vld [vmem:[#allocation5 + $0x348] sm:$0xff]  ;;  %v296_v19 = vld [vmem:[#allocation5 + $0x360] sm:$0xff]  ;;  %v3728_v59 = vld [vmem:[#allocation2 + $0x38] sm:$0xff] }
  0x53   :  { %v297_v15 = vld [vmem:[#allocation5 + $0x368] sm:$0xff]  ;;  %v2760_v22 = vpack.c.bf16 %v296_v19, %v292_v18  ;;  %v300_v24 = vld [vmem:[#allocation5 + $0x380] sm:$0xff]  ;;  %v214_v61 = vld [vmem:[#allocation5 + $0xd0] sm:$0xff] }
  0x54   :  { %2733 = vmatpush1.bf16.msra.mxu1 %v2732_v44  ;;  %v2758_v17 = vpack.c.bf16 %v297_v15, %v293_v14  ;;  %v301_v20 = vld [vmem:[#allocation5 + $0x388] sm:$0xff]  ;;  %v304_v25 = vld [vmem:[#allocation5 + $0x3a0] sm:$0xff]  ;;  %v2774_v44 = vpack.c.bf16 %v203_v39, %v199_v38  ;;  %v227_v0 = vld [vmem:[#allocation5 + $0x138] sm:$0xff] }
  0x55   :  { %2735 = vmatprep.subr.bf16.mxu1 %v2734_v45  ;;  %v305_v21 = vld [vmem:[#allocation5 + $0x3a8] sm:$0xff]  ;;  %v2764_v28 = vpack.c.bf16 %v304_v25, %v300_v24  ;;  %v308_v30 = vld [vmem:[#allocation5 + $0x3c0] sm:$0xff]  ;;  %v198_v45 = vld [vmem:[#allocation5 + $0x50] sm:$0xff] }
  0x56   :  { %v2762_v23 = vpack.c.bf16 %v305_v21, %v301_v20  ;;  %v309_v26 = vld [vmem:[#allocation5 + $0x3c8] sm:$0xff]  ;;  %v312_v31 = vld [vmem:[#allocation5 + $0x3e0] sm:$0xff]  ;;  %v3732_v1 = vld [vmem:[#allocation2 + $0x30] sm:$0xff] }
  0x57   :  { %v313_v27 = vld [vmem:[#allocation5 + $0x3e8] sm:$0xff]  ;;  %v2768_v34 = vpack.c.bf16 %v312_v31, %v308_v30  ;;  %v3714_v40 = vld [vmem:[#allocation2] sm:$0xff]  ;;  %v226_v6 = vld [vmem:[#allocation5 + $0x130] sm:$0xff] }
  0x58   :  { %2737 = vmatpush1.bf16.msra.mxu1 %v2736_v50  ;;  %v2766_v29 = vpack.c.bf16 %v313_v27, %v309_v26  ;;  %v2776_v50 = vpack.c.bf16 %v202_v46, %v198_v45  ;;  %v3734_v3 = vld [vmem:[#allocation2 + $0x48] sm:$0xff]  ;;  %v231_v7 = vld [vmem:[#allocation5 + $0x158] sm:$0xff]  ;;  %v3738_v9 = vld [vmem:[#allocation2 + $0x40] sm:$0xff] }
  0x59   :  { %2739 = vmatprep.subr.bf16.mxu1 %v2738_v51  ;;  %v3722_v51 = vld [vmem:[#allocation2 + $0x28] sm:$0xff]  ;;  %v235_v8 = vld [vmem:[#allocation5 + $0x178] sm:$0xff]  ;;  %v230_v13 = vld [vmem:[#allocation5 + $0x150] sm:$0xff] }
  0x5a   :  { %v2790_v12 = vpack.c.bf16 %v235_v8, %v231_v7  ;;  %v234_v14 = vld [vmem:[#allocation5 + $0x170] sm:$0xff]  ;;  %v239_v15 = vld [vmem:[#allocation5 + $0x198] sm:$0xff]  ;;  %v3746_v19 = vld [vmem:[#allocation2 + $0x68] sm:$0xff] }
  0x5b   :  { %v2792_v18 = vpack.c.bf16 %v234_v14, %v230_v13  ;;  %v238_v21 = vld [vmem:[#allocation5 + $0x190] sm:$0xff]  ;;  %v251_v24 = vld [vmem:[#allocation5 + $0x1f8] sm:$0xff]  ;;  %v3750_v25 = vld [vmem:[#allocation2 + $0x60] sm:$0xff] }
  0x5c   :  { %2741 = vmatpush1.bf16.msra.mxu1 %v2740_v56  ;;  %v219_v56 = vld [vmem:[#allocation5 + $0xf8] sm:$0xff]  ;;  %v250_v30 = vld [vmem:[#allocation5 + $0x1f0] sm:$0xff]  ;;  %v3782_v14 = vld [vmem:[#allocation2 + $0xc8] sm:$0xff] }
  0x5d   :  { %2743 = vmatprep.subr.bf16.mxu1 %v2742_v57  ;;  %v3726_v57 = vld [vmem:[#allocation2 + $0x20] sm:$0xff]  ;;  %v2782_v60 = vpack.c.bf16 %v219_v56, %v215_v55  ;;  %v3752_v27 = vld [vmem:[#allocation2 + $0x78] sm:$0xff]  ;;  %v3756_v33 = vld [vmem:[#allocation2 + $0x70] sm:$0xff] }
  0x5e   :  { %v255_v31 = vld [vmem:[#allocation5 + $0x218] sm:$0xff]  ;;  %v254_v37 = vld [vmem:[#allocation5 + $0x210] sm:$0xff]  ;;  %v3770_v56 = vld [vmem:[#allocation2 + $0xa8] sm:$0xff] }
  0x5f   :  { %v259_v32 = vld [vmem:[#allocation5 + $0x238] sm:$0xff]  ;;  %v258_v38 = vld [vmem:[#allocation5 + $0x230] sm:$0xff] }
  0x60   :  { %2745 = vmatpush1.bf16.msra.mxu1 %v2744_v62  ;;  %v218_v62 = vld [vmem:[#allocation5 + $0xf0] sm:$0xff]  ;;  %v2802_v36 = vpack.c.bf16 %v259_v32, %v255_v31  ;;  %v263_v39 = vld [vmem:[#allocation5 + $0x258] sm:$0xff]  ;;  %v2804_v45 = vpack.c.bf16 %v258_v38, %v254_v37  ;;  %v1791_v32 = vld [vmem:[#allocation7 + $0x8] sm:$0xff] }
  0x61   :  { %2747 = vmatprep.subr.bf16.mxu1 %v2746_v63  ;;  %v223_v63 = vld [vmem:[#allocation5 + $0x118] sm:$0xff]  ;;  %v2784_v2 = vpack.c.bf16 %v218_v62, %v214_v61  ;;  %v262_v48 = vld [vmem:[#allocation5 + $0x250] sm:$0xff]  ;;  %v1790_v37 = vld [vmem:[#allocation7] sm:$0xff] }
  0x62   :  { %v3764_v46 = vld [vmem:[#allocation2 + $0x98] sm:$0xff]  ;;  %v3768_v54 = vld [vmem:[#allocation2 + $0x90] sm:$0xff] }
  0x63   :  { %v275_v53 = vld [vmem:[#allocation5 + $0x2b8] sm:$0xff]  ;;  %v274_v61 = vld [vmem:[#allocation5 + $0x2b0] sm:$0xff] }
  0x64   :  { %2749 = vmatpush1.bf16.msra.mxu1 %v2748_v4  ;;  %v2786_v4 = vpack.c.bf16 %v227_v0, %v223_v63  ;;  %v279_v62 = vld [vmem:[#allocation5 + $0x2d8] sm:$0xff]  ;;  %v3774_v0 = vld [vmem:[#allocation2 + $0xa0] sm:$0xff]  ;;  %v282_v7 = vld [vmem:[#allocation5 + $0x2f0] sm:$0xff] }
  0x65   :  { %2751 = vmatprep.subr.bf16.mxu1 %v2750_v5  ;;  %v222_v5 = vld [vmem:[#allocation5 + $0x110] sm:$0xff]  ;;  %v283_v63 = vld [vmem:[#allocation5 + $0x2f8] sm:$0xff] }
  0x66   :  { %v287_v8 = vld [vmem:[#allocation5 + $0x318] sm:$0xff]  ;;  %v1792_v38 = vld [vmem:[#allocation7 + $0x10] sm:$0xff] }
  0x67   :  { %v307_v31 = vld [vmem:[#allocation5 + $0x3b8] sm:$0xff] }
  0x68   :  { %2753 = vmatpush1.bf16.msra.mxu1 %v2752_v10  ;;  %v2788_v10 = vpack.c.bf16 %v226_v6, %v222_v5  ;;  %v2814_v5 = vpack.c.bf16 %v283_v63, %v279_v62  ;;  %v278_v6 = vld [vmem:[#allocation5 + $0x2d0] sm:$0xff]  ;;  %v1794_v62 = vld [vmem:[#allocation7 + $0x20] sm:$0xff] }
  0x69   :  { %2755 = vmatprep.subr.bf16.mxu1 %v2754_v11  ;;  %v3740_v11 = vld [vmem:[#allocation2 + $0x58] sm:$0xff]  ;;  %v2816_v13 = vpack.c.bf16 %v282_v7, %v278_v6  ;;  %v1796_v63 = vld [vmem:[#allocation7 + $0x30] sm:$0xff] }
  0x6a   :  { %v2840_v6 = vpack.c.bf16 %v1796_v63, %v1794_v62  ;;  %v3800_v7 = vld [vmem:[#allocation2 + $0xf8] sm:$0xff] }
  0x6b   :  { %v1813_v62 = vld [vmem:[#allocation7 + $0xb8] sm:$0xff] }
  0x6c   :  { %2757 = vmatpush1.bf16.msra.mxu1 %v2756_v16  ;;  %v243_v16 = vld [vmem:[#allocation5 + $0x1b8] sm:$0xff] }
  0x6d   :  { %2759 = vmatprep.subr.bf16.mxu1 %v2758_v17  ;;  %v3744_v17 = vld [vmem:[#allocation2 + $0x50] sm:$0xff]  ;;  %v2794_v20 = vpack.c.bf16 %v243_v16, %v239_v15 }
  0x6e   :  { %v286_v16 = vld [vmem:[#allocation5 + $0x310] sm:$0xff] }
  0x70   :  { %2761 = vmatpush1.bf16.msra.mxu1 %v2760_v22  ;;  %v242_v22 = vld [vmem:[#allocation5 + $0x1b0] sm:$0xff] }
  0x71   :  { %2763 = vmatprep.subr.bf16.mxu1 %v2762_v23  ;;  %v247_v23 = vld [vmem:[#allocation5 + $0x1d8] sm:$0xff]  ;;  %v2796_v26 = vpack.c.bf16 %v242_v22, %v238_v21  ;;  %v3786_v22 = vld [vmem:[#allocation2 + $0xc0] sm:$0xff] }
  0x72   :  { %v299_v21 = vld [vmem:[#allocation5 + $0x378] sm:$0xff] }
  0x74   :  { %2765 = vmatpush1.bf16.msra.mxu1 %v2764_v28  ;;  %v2798_v28 = vpack.c.bf16 %v251_v24, %v247_v23  ;;  %v3788_v23 = vld [vmem:[#allocation2 + $0xd8] sm:$0xff] }
  0x75   :  { %2767 = vmatprep.subr.bf16.mxu1 %v2766_v29  ;;  %v246_v29 = vld [vmem:[#allocation5 + $0x1d0] sm:$0xff] }
  0x78   :  { %2769 = vmatpush1.bf16.msra.mxu1 %v2768_v34  ;;  %v2800_v34 = vpack.c.bf16 %v250_v30, %v246_v29  ;;  %v298_v29 = vld [vmem:[#allocation5 + $0x370] sm:$0xff]  ;;  %v303_v30 = vld [vmem:[#allocation5 + $0x398] sm:$0xff] }
  0x79   :  { %2771 = vmatprep.subr.bf16.mxu1 %v2770_v35  ;;  %v3758_v35 = vld [vmem:[#allocation2 + $0x88] sm:$0xff] }
  0x7b   :  { %381 = vmatmul.mubr.f32.vlgmr.msra.gmra.mrb[0].mxu1 %v3714_v40 }
  0x7c   :  { %2773 = vmatpush1.bf16.msra.mxu1 %v2772_v42  ;;  %386 = vmatprep.mubr.f32.mxu1 %v3716_v43  ;;  %v267_v42 = vld [vmem:[#allocation5 + $0x278] sm:$0xff] }
  0x7d   :  { %2775 = vmatprep.subr.bf16.mxu1 %v2774_v44  ;;  %v3762_v44 = vld [vmem:[#allocation2 + $0x80] sm:$0xff]  ;;  %v2806_v47 = vpack.c.bf16 %v267_v42, %v263_v39  ;;  %v3792_v39 = vld [vmem:[#allocation2 + $0xd0] sm:$0xff]  ;;  %v3794_v42 = vld [vmem:[#allocation2 + $0xe8] sm:$0xff] }
  0x7f   :  { %387 = vmatmul.mubr.f32.gmra.mrb[2].mxu1 %v3720_v49 }
  0x80   :  { %392 = vmatprep.mubr.f32.mxu1 %v3722_v51  ;;  %2777 = vmatpush1.bf16.msra.mxu1 %v2776_v50  ;;  %v266_v50 = vld [vmem:[#allocation5 + $0x270] sm:$0xff] }
  0x81   :  { %2779 = vmatprep.subr.bf16.mxu1 %v2778_v52  ;;  %v271_v52 = vld [vmem:[#allocation5 + $0x298] sm:$0xff]  ;;  %v2808_v55 = vpack.c.bf16 %v266_v50, %v262_v48  ;;  %v2826_v48 = vpack.c.bf16 %v307_v31, %v303_v30  ;;  %v302_v50 = vld [vmem:[#allocation5 + $0x390] sm:$0xff]  ;;  %v1803_v30 = vld [vmem:[#allocation7 + $0x68] sm:$0xff] }
  0x82   :  { %v1805_v31 = vld [vmem:[#allocation7 + $0x78] sm:$0xff] }
  0x83   :  { %393 = vmatmul.mubr.f32.gmra.mrb[4].mxu1 %v3726_v57 }
  0x84   :  { %398 = vmatprep.mubr.f32.mxu1 %v3728_v59  ;;  %2781 = vmatpush1.bf16.msra.mxu1 %v2780_v58  ;;  %v2810_v58 = vpack.c.bf16 %v275_v53, %v271_v52  ;;  %v306_v52 = vld [vmem:[#allocation5 + $0x3b0] sm:$0xff]  ;;  %v311_v53 = vld [vmem:[#allocation5 + $0x3d8] sm:$0xff] }
  0x85   :  { %2783 = vmatprep.subr.bf16.mxu1 %v2782_v60  ;;  %v270_v60 = vld [vmem:[#allocation5 + $0x290] sm:$0xff] }
  0x87   :  { %399 = vmatmul.mubr.f32.gmra.mrb[6].mxu1 %v3732_v1 }
  0x88   :  { %404 = vmatprep.mubr.f32.mxu1 %v3734_v3  ;;  %2785 = vmatpush1.bf16.msra.mxu1 %v2784_v2  ;;  %v2812_v2 = vpack.c.bf16 %v274_v61, %v270_v60  ;;  %v1797_v60 = vld [vmem:[#allocation7 + $0x38] sm:$0xff] }
  0x89   :  { %2787 = vmatprep.subr.bf16.mxu1 %v2786_v4  ;;  %v3776_v4 = vld [vmem:[#allocation2 + $0xb8] sm:$0xff] }
  0x8b   :  { %405 = vmatmul.mubr.f32.gmra.mrb[8].mxu1 %v3738_v9 }
  0x8c   :  { %410 = vmatprep.mubr.f32.mxu1 %v3740_v11  ;;  %2789 = vmatpush1.bf16.msra.mxu1 %v2788_v10  ;;  %v291_v10 = vld [vmem:[#allocation5 + $0x338] sm:$0xff] }
  0x8d   :  { %2791 = vmatprep.subr.bf16.mxu1 %v2790_v12  ;;  %v3780_v12 = vld [vmem:[#allocation2 + $0xb0] sm:$0xff]  ;;  %v2818_v15 = vpack.c.bf16 %v291_v10, %v287_v8 }
  0x8e   :  { %v310_v10 = vld [vmem:[#allocation5 + $0x3d0] sm:$0xff] }
  0x8f   :  { %411 = vmatmul.mubr.f32.gmra.mrb[10].mxu1 %v3744_v17 }
  0x90   :  { %416 = vmatprep.mubr.f32.mxu1 %v3746_v19  ;;  %2793 = vmatpush1.bf16.msra.mxu1 %v2792_v18  ;;  %v290_v18 = vld [vmem:[#allocation5 + $0x330] sm:$0xff] }
  0x91   :  { %2795 = vmatprep.subr.bf16.mxu1 %v2794_v20  ;;  %v295_v20 = vld [vmem:[#allocation5 + $0x358] sm:$0xff]  ;;  %v2820_v24 = vpack.c.bf16 %v290_v18, %v286_v16 }
  0x92   :  { %v1801_v16 = vld [vmem:[#allocation7 + $0x58] sm:$0xff] }
  0x93   :  { %417 = vmatmul.mubr.f32.gmra.mrb[12].mxu1 %v3750_v25 }
  0x94   :  { %422 = vmatprep.mubr.f32.mxu1 %v3752_v27  ;;  %2797 = vmatpush1.bf16.msra.mxu1 %v2796_v26  ;;  %v2822_v26 = vpack.c.bf16 %v299_v21, %v295_v20  ;;  %v1798_v20 = vld [vmem:[#allocation7 + $0x40] sm:$0xff]  ;;  %v1800_v21 = vld [vmem:[#allocation7 + $0x50] sm:$0xff] }
  0x95   :  { %2799 = vmatprep.subr.bf16.mxu1 %v2798_v28  ;;  %v294_v28 = vld [vmem:[#allocation5 + $0x350] sm:$0xff] }
  0x97   :  { %423 = vmatmul.mubr.f32.gmra.mrb[14].mxu1 %v3756_v33 }
  0x98   :  { %428 = vmatprep.mubr.f32.mxu1 %v3758_v35  ;;  %2801 = vmatpush1.bf16.msra.mxu1 %v2800_v34  ;;  %v1793_v34 = vld [vmem:[#allocation7 + $0x18] sm:$0xff] }
  0x99   :  { %2803 = vmatprep.subr.bf16.mxu1 %v2802_v36  ;;  %v2834_v36 = vpack.c.bf16 %v1793_v34, %v1791_v32  ;;  %v2846_v32 = vpack.c.bf16 %v1805_v31, %v1803_v30  ;;  %v1802_v34 = vld [vmem:[#allocation7 + $0x60] sm:$0xff]  ;;  %v3830_v30 = vld [vmem:[#allocation2 + $0x148] sm:$0xff] }
  0x9a   :  { %v1819_v31 = vld [vmem:[#allocation7 + $0xe8] sm:$0xff] }
  0x9b   :  { %429 = vmatmul.mubr.f32.gmra.mrb[16].mxu1 %v3762_v44  ;;  %2835 = vmatprep.subr.bf16.mxu0 %v2834_v36  ;;  %v1804_v36 = vld [vmem:[#allocation7 + $0x70] sm:$0xff] }
  0x9c   :  { %434 = vmatprep.mubr.f32.mxu1 %v3764_v46  ;;  %2805 = vmatpush1.bf16.msra.mxu1 %v2804_v45  ;;  %v2824_v45 = vpack.c.bf16 %v298_v29, %v294_v28  ;;  %v2844_v28 = vpack.c.bf16 %v1800_v21, %v1798_v20  ;;  %v3806_v29 = vld [vmem:[#allocation2 + $0x108] sm:$0xff]  ;;  %v1814_v20 = vld [vmem:[#allocation7 + $0xc0] sm:$0xff]  ;;  %v1816_v21 = vld [vmem:[#allocation7 + $0xd0] sm:$0xff] }
  0x9d   :  { %2807 = vmatprep.subr.bf16.mxu1 %v2806_v47  ;;  %v2836_v47 = vpack.c.bf16 %v1792_v38, %v1790_v37  ;;  %v3810_v37 = vld [vmem:[#allocation2 + $0x100] sm:$0xff]  ;;  %v2848_v38 = vpack.c.bf16 %v1804_v36, %v1802_v34 }
  0x9e   :  { %v1818_v36 = vld [vmem:[#allocation7 + $0xe0] sm:$0xff] }
  0x9f   :  { %435 = vmatmul.mubr.f32.gmra.mrb[18].mxu1 %v3768_v54  ;;  %2837 = vmatpush1.bf16.msra.mxu0 %v2836_v47  ;;  %v1807_v47 = vld [vmem:[#allocation7 + $0x88] sm:$0xff] }
  0xa0   :  { %440 = vmatprep.mubr.f32.mxu1 %v3770_v56  ;;  %2809 = vmatpush1.bf16.msra.mxu1 %v2808_v55  ;;  %v315_v55 = vld [vmem:[#allocation5 + $0x3f8] sm:$0xff] }
  0xa1   :  { %2811 = vmatprep.subr.bf16.mxu1 %v2810_v58  ;;  %v1795_v58 = vld [vmem:[#allocation7 + $0x28] sm:$0xff]  ;;  %v2830_v8 = vpack.c.bf16 %v315_v55, %v311_v53  ;;  %v1808_v53 = vld [vmem:[#allocation7 + $0x90] sm:$0xff] }
  0xa2   :  { %v2838_v61 = vpack.c.bf16 %v1797_v60, %v1795_v58  ;;  %v3816_v55 = vld [vmem:[#allocation2 + $0x110] sm:$0xff]  ;;  %v3818_v60 = vld [vmem:[#allocation2 + $0x128] sm:$0xff] }
  0xa3   :  { %441 = vmatmul.mubr.f32.gmra.mrb[20].mxu1 %v3774_v0 }
  0xa4   :  { %446 = vmatprep.mubr.f32.mxu1 %v3776_v4  ;;  %2813 = vmatpush1.bf16.msra.mxu1 %v2812_v2  ;;  %v3798_v2 = vld [vmem:[#allocation2 + $0xe0] sm:$0xff] }
  0xa5   :  { %2815 = vmatprep.subr.bf16.mxu1 %v2814_v5  ;;  %v2828_v5 = vpack.c.bf16 %v306_v52, %v302_v50  ;;  %2839 = vmatprep.subr.bf16.mxu0 %v2838_v61  ;;  %v1806_v52 = vld [vmem:[#allocation7 + $0x80] sm:$0xff]  ;;  %v1811_v61 = vld [vmem:[#allocation7 + $0xa8] sm:$0xff] }
  0xa6   :  { %2841 = vmatpush1.bf16.msra.mxu0 %v2840_v6  ;;  %v2852_v58 = vpack.c.bf16 %v1808_v53, %v1806_v52  ;;  %v2854_v63 = vpack.c.bf16 %v1813_v62, %v1811_v61  ;;  %v1812_v6 = vld [vmem:[#allocation7 + $0xb0] sm:$0xff]  ;;  %v1823_v52 = vld [vmem:[#allocation7 + $0x108] sm:$0xff]  ;;  %v1825_v53 = vld [vmem:[#allocation7 + $0x118] sm:$0xff] }
  0xa7   :  { %447 = vmatmul.mubr.f32.gmra.mrb[22].mxu1 %v3780_v12  ;;  %v1822_v61 = vld [vmem:[#allocation7 + $0x100] sm:$0xff]  ;;  %v1824_v62 = vld [vmem:[#allocation7 + $0x110] sm:$0xff] }
  0xa8   :  { %452 = vmatprep.mubr.f32.mxu1 %v3782_v14  ;;  %2817 = vmatpush1.bf16.msra.mxu1 %v2816_v13  ;;  %v314_v13 = vld [vmem:[#allocation5 + $0x3f0] sm:$0xff] }
  0xa9   :  { %2819 = vmatprep.subr.bf16.mxu1 %v2818_v15  ;;  %v1799_v15 = vld [vmem:[#allocation7 + $0x48] sm:$0xff] }
  0xaa   :  { %v2842_v18 = vpack.c.bf16 %v1801_v16, %v1799_v15  ;;  %v1815_v15 = vld [vmem:[#allocation7 + $0xc8] sm:$0xff]  ;;  %v1817_v16 = vld [vmem:[#allocation7 + $0xd8] sm:$0xff] }
  0xab   :  { %453 = vmatmul.mubr.f32.gmra.mrb[24].mxu1 %v3786_v22 }
  0xac   :  { %458 = vmatprep.mubr.f32.mxu1 %v3788_v23  ;;  %2821 = vmatpush1.bf16.msra.mxu1 %v2820_v24  ;;  %v3804_v24 = vld [vmem:[#allocation2 + $0xf0] sm:$0xff] }
  0xad   :  { %2823 = vmatprep.subr.bf16.mxu1 %v2822_v26  ;;  %v2832_v26 = vpack.c.bf16 %v314_v13, %v310_v10  ;;  %2843 = vmatprep.subr.bf16.mxu0 %v2842_v18  ;;  %v3824_v13 = vld [vmem:[#allocation2 + $0x138] sm:$0xff]  ;;  %v2858_v18 = vpack.c.bf16 %v1817_v16, %v1815_v15 }
  0xae   :  { %2845 = vmatpush1.bf16.msra.mxu0 %v2844_v28  ;;  %v2860_v28 = vpack.c.bf16 %v1816_v21, %v1814_v20  ;;  %v1829_v15 = vld [vmem:[#allocation7 + $0x138] sm:$0xff]  ;;  %v1828_v20 = vld [vmem:[#allocation7 + $0x130] sm:$0xff]  ;;  %v3846_v21 = vld [vmem:[#allocation2 + $0x160] sm:$0xff] }
  0xaf   :  { %459 = vmatmul.mubr.f32.gmra.mrb[26].mxu1 %v3792_v39  ;;  %2847 = vmatprep.subr.bf16.mxu0 %v2846_v32  ;;  %v1821_v32 = vld [vmem:[#allocation7 + $0xf8] sm:$0xff] }
  0xb0   :  { %464 = vmatprep.mubr.f32.mxu1 %v3794_v42  ;;  %2825 = vmatpush1.bf16.msra.mxu1 %v2824_v45  ;;  %v3812_v45 = vld [vmem:[#allocation2 + $0x118] sm:$0xff]  ;;  %v2862_v34 = vpack.c.bf16 %v1821_v32, %v1819_v31  ;;  %v1831_v32 = vld [vmem:[#allocation7 + $0x148] sm:$0xff] }
  0xb1   :  { %2827 = vmatprep.subr.bf16.mxu1 %v2826_v48  ;;  %v1809_v48 = vld [vmem:[#allocation7 + $0x98] sm:$0xff] }
  0xb2   :  { %2849 = vmatpush1.bf16.msra.mxu0 %v2848_v38  ;;  %v2850_v50 = vpack.c.bf16 %v1809_v48, %v1807_v47  ;;  %v1820_v38 = vld [vmem:[#allocation7 + $0xf0] sm:$0xff]  ;;  %v3834_v47 = vld [vmem:[#allocation2 + $0x140] sm:$0xff]  ;;  %v3848_v31 = vld [vmem:[#allocation2 + $0x178] sm:$0xff] }
  0xb3   :  { %465 = vmatmul.mubr.f32.gmra.mrb[28].mxu1 %v3798_v2  ;;  %v2864_v48 = vpack.c.bf16 %v1820_v38, %v1818_v36  ;;  %v1830_v38 = vld [vmem:[#allocation7 + $0x140] sm:$0xff] }
  0xb4   :  { %470 = vmatprep.mubr.f32.mxu1 %v3800_v7  ;;  %2829 = vmatpush1.bf16.msra.mxu1 %v2828_v5  ;;  %v1810_v5 = vld [vmem:[#allocation7 + $0xa0] sm:$0xff] }
  0xb5   :  { %2831 = vmatprep.subr.bf16.mxu1 %v2830_v8  ;;  %2851 = vmatprep.subr.bf16.mxu0 %v2850_v50  ;;  %v3822_v8 = vld [vmem:[#allocation2 + $0x120] sm:$0xff]  ;;  %v2856_v10 = vpack.c.bf16 %v1812_v6, %v1810_v5  ;;  %v3836_v50 = vld [vmem:[#allocation2 + $0x158] sm:$0xff]  ;;  %v2868_v5 = vpack.c.bf16 %v1824_v62, %v1822_v61  ;;  %v3842_v6 = vld [vmem:[#allocation2 + $0x168] sm:$0xff] }
  0xb6   :  { %2853 = vmatpush1.bf16.msra.mxu0 %v2852_v58  ;;  %v2866_v58 = vpack.c.bf16 %v1825_v53, %v1823_v52  ;;  %v3852_v52 = vld [vmem:[#allocation2 + $0x170] sm:$0xff]  ;;  %v1835_v61 = vld [vmem:[#allocation7 + $0x168] sm:$0xff]  ;;  %v1837_v62 = vld [vmem:[#allocation7 + $0x178] sm:$0xff] }
  0xb7   :  { %471 = vmatmul.mubr.f32.gmra.mrb[30].mxu1 %v3804_v24  ;;  %2855 = vmatprep.subr.bf16.mxu0 %v2854_v63  ;;  %v3840_v63 = vld [vmem:[#allocation2 + $0x150] sm:$0xff] }
  0xb8   :  { %476 = vmatprep.mubr.f32.mxu1 %v3806_v29  ;;  %2833 = vmatpush1.bf16.msra.mxu1 %v2832_v26  ;;  %v3828_v26 = vld [vmem:[#allocation2 + $0x130] sm:$0xff] }
  0xba   :  { %2857 = vmatpush1.bf16.msra.mxu0 %v2856_v10  ;;  %v1827_v10 = vld [vmem:[#allocation7 + $0x128] sm:$0xff] }
  0xbb   :  { %477 = vmatmul.mubr.f32.gmra.mrb[32].mxu1 %v3810_v37  ;;  %2859 = vmatprep.subr.bf16.mxu0 %v2858_v18  ;;  %v2870_v16 = vpack.c.bf16 %v1829_v15, %v1827_v10  ;;  %v1826_v18 = vld [vmem:[#allocation7 + $0x120] sm:$0xff]  ;;  %v1836_v15 = vld [vmem:[#allocation7 + $0x170] sm:$0xff] }
  0xbc   :  { %482 = vmatprep.mubr.f32.mxu1 %v3812_v45  ;;  %v1834_v10 = vld [vmem:[#allocation7 + $0x160] sm:$0xff] }
  0xbe   :  { %2861 = vmatpush1.bf16.msra.mxu0 %v2860_v28  ;;  %v2872_v28 = vpack.c.bf16 %v1828_v20, %v1826_v18  ;;  %v2880_v18 = vpack.c.bf16 %v1836_v15, %v1834_v10  ;;  %v3860_v20 = vld [vmem:[#allocation2 + $0x198] sm:$0xff] }
  0xbf   :  { %483 = vmatmul.mubr.f32.gmra.mrb[34].mxu1 %v3816_v55  ;;  %2863 = vmatprep.subr.bf16.mxu0 %v2862_v34  ;;  %v1833_v34 = vld [vmem:[#allocation7 + $0x158] sm:$0xff]  ;;  %4507 = vst [vmem:[#allocation14_spill] sm:$0xff] %v3860_v20 }
  0xc0   :  { %488 = vmatprep.mubr.f32.mxu1 %v3818_v60  ;;  %v2874_v36 = vpack.c.bf16 %v1833_v34, %v1831_v32  ;;  %v1839_v32 = vld [vmem:[#allocation7 + $0x188] sm:$0xff]  ;;  %v1841_v34 = vld [vmem:[#allocation7 + $0x198] sm:$0xff] }
  0xc1   :  { %v1845_v10 = vld [vmem:[#allocation7 + $0x1b8] sm:$0xff] }
  0xc2   :  { %2865 = vmatpush1.bf16.msra.mxu0 %v2864_v48  ;;  %v1832_v48 = vld [vmem:[#allocation7 + $0x150] sm:$0xff]  ;;  %v3872_v15 = vld [vmem:[#allocation2 + $0x1b8] sm:$0xff] }
  0xc3   :  { %489 = vmatmul.mubr.f32.gmra.mrb[36].mxu1 %v3822_v8  ;;  %2867 = vmatprep.subr.bf16.mxu0 %v2866_v58  ;;  %v2876_v53 = vpack.c.bf16 %v1832_v48, %v1830_v38  ;;  %v3854_v58 = vld [vmem:[#allocation2 + $0x188] sm:$0xff]  ;;  %v2882_v38 = vpack.c.bf16 %v1841_v34, %v1839_v32  ;;  %v1838_v48 = vld [vmem:[#allocation7 + $0x180] sm:$0xff]  ;;  %4511 = vst [vmem:[#allocation18_spill] sm:$0xff] %v3872_v15  ;;  %v3876_v32 = vld [vmem:[#allocation2 + $0x1b0] sm:$0xff] }
  0xc4   :  { %494 = vmatprep.mubr.f32.mxu1 %v3824_v13  ;;  %4505 = vst [vmem:[#allocation12_spill] sm:$0xff] %v3854_v58  ;;  %v1847_v34 = vld [vmem:[#allocation7 + $0x1c8] sm:$0xff] }
  0xc6   :  { %2869 = vmatpush1.bf16.msra.mxu0 %v2868_v5  ;;  %v2878_v5 = vpack.c.bf16 %v1837_v62, %v1835_v61  ;;  %v3870_v62 = vld [vmem:[#allocation2 + $0x1a0] sm:$0xff] }
  0xc7   :  { %495 = vmatmul.mubr.f32.gmra.mrb[38].mxu1 %v3828_v26  ;;  %2871 = vmatprep.subr.bf16.mxu0 %v2870_v16  ;;  %v3858_v16 = vld [vmem:[#allocation2 + $0x180] sm:$0xff]  ;;  %4510 = vst [vmem:[#allocation17_spill] sm:$0xff] %v3870_v62 }
  0xc8   :  { %500 = vmatprep.mubr.f32.mxu1 %v3830_v30  ;;  %4506 = vst [vmem:[#allocation13_spill] sm:$0xff] %v3858_v16 }
  0xca   :  { %2873 = vmatpush1.bf16.msra.mxu0 %v2872_v28  ;;  %v3864_v28 = vld [vmem:[#allocation2 + $0x190] sm:$0xff] }
  0xcb   :  { %501 = vmatmul.mubr.f32.gmra.mrb[40].mxu1 %v3834_v47  ;;  %2875 = vmatprep.subr.bf16.mxu0 %v2874_v36  ;;  %4508 = vst [vmem:[#allocation15_spill] sm:$0xff] %v3864_v28  ;;  %v3866_v36 = vld [vmem:[#allocation2 + $0x1a8] sm:$0xff] }
  0xcc   :  { %506 = vmatprep.mubr.f32.mxu1 %v3836_v50  ;;  %4509 = vst [vmem:[#allocation16_spill] sm:$0xff] %v3866_v36 }
  0xce   :  { %2877 = vmatpush1.bf16.msra.mxu0 %v2876_v53  ;;  %v1840_v53 = vld [vmem:[#allocation7 + $0x190] sm:$0xff] }
  0xcf   :  { %507 = vmatmul.mubr.f32.gmra.mrb[42].mxu1 %v3840_v63  ;;  %2879 = vmatprep.subr.bf16.mxu0 %v2878_v5  ;;  %v2884_v61 = vpack.c.bf16 %v1840_v53, %v1838_v48  ;;  %v1843_v5 = vld [vmem:[#allocation7 + $0x1a8] sm:$0xff] }
  0xd0   :  { %512 = vmatprep.mubr.f32.mxu1 %v3842_v6  ;;  %v3878_v48 = vld [vmem:[#allocation2 + $0x1c8] sm:$0xff] }
  0xd2   :  { %2881 = vmatpush1.bf16.msra.mxu0 %v2880_v18  ;;  %v2886_v18 = vpack.c.bf16 %v1845_v10, %v1843_v5  ;;  %v1853_v5 = vld [vmem:[#allocation7 + $0x1f8] sm:$0xff] }
  0xd3   :  { %513 = vmatmul.mubr.f32.gmra.mrb[44].mxu1 %v3846_v21  ;;  %2883 = vmatprep.subr.bf16.mxu0 %v2882_v38  ;;  %v1849_v38 = vld [vmem:[#allocation7 + $0x1d8] sm:$0xff] }
  0xd4   :  { %518 = vmatprep.mubr.f32.mxu1 %v3848_v31  ;;  %v2890_v53 = vpack.c.bf16 %v1849_v38, %v1847_v34  ;;  %v3884_v10 = vld [vmem:[#allocation2 + $0x1d8] sm:$0xff]  ;;  %v3890_v34 = vld [vmem:[#allocation2 + $0x1e8] sm:$0xff] }
  0xd5   :  { %v3896_v38 = vld [vmem:[#allocation2 + $0x1f8] sm:$0xff] }
  0xd6   :  { %2885 = vmatpush1.bf16.msra.mxu0 %v2884_v61  ;;  %v1846_v61 = vld [vmem:[#allocation7 + $0x1c0] sm:$0xff] }
  0xd7   :  { %519 = vmatmul.mubr.f32.gmra.mrb[46].mxu1 %v3852_v52  ;;  %2887 = vmatprep.subr.bf16.mxu0 %v2886_v18  ;;  %v1850_v18 = vld [vmem:[#allocation7 + $0x1e0] sm:$0xff] }
  0xd8   :  { %524 = vmatprep.mubr.f32.mxu1 %v3854_v58 }
  0xdb   :  { %525 = vmatmul.mubr.f32.gmra.mrb[48].mxu1 %v3858_v16  ;;  %v1844_v16 = vld [vmem:[#allocation7 + $0x1b0] sm:$0xff] }
  0xdc   :  { %530 = vmatprep.mubr.f32.mxu1 %v3860_v20  ;;  %v1842_v20 = vld [vmem:[#allocation7 + $0x1a0] sm:$0xff] }
  0xdd   :  { %v2888_v58 = vpack.c.bf16 %v1844_v16, %v1842_v20  ;;  %v3882_v16 = vld [vmem:[#allocation2 + $0x1c0] sm:$0xff]  ;;  %v1851_v20 = vld [vmem:[#allocation7 + $0x1e8] sm:$0xff] }
  0xdf   :  { %531 = vmatmul.mubr.f32.gmra.mrb[50].mxu1 %v3864_v28  ;;  %2889 = vmatpush1.bf16.msra.mxu0 %v2888_v58  ;;  %v2894_v58 = vpack.c.bf16 %v1853_v5, %v1851_v20  ;;  %v1856_v20 = vld [vmem:[#allocation7 + $0x210] sm:$0xff]  ;;  %v1859_v5 = vld [vmem:[#allocation7 + $0x228] sm:$0xff] }
  0xe0   :  { %536 = vmatprep.mubr.f32.mxu1 %v3866_v36  ;;  %v1848_v36 = vld [vmem:[#allocation7 + $0x1d0] sm:$0xff]  ;;  %2891 = vmatprep.subr.bf16.mxu0 %v2890_v53  ;;  %v1857_v53 = vld [vmem:[#allocation7 + $0x218] sm:$0xff] }
  0xe1   :  { %v2892_v28 = vpack.c.bf16 %v1848_v36, %v1846_v61  ;;  %v3888_v36 = vld [vmem:[#allocation2 + $0x1d0] sm:$0xff] }
  0xe3   :  { %537 = vmatmul.mubr.f32.gmra.mrb[52].mxu1 %v3870_v62  ;;  %2893 = vmatpush1.bf16.msra.mxu0 %v2892_v28  ;;  %v3894_v28 = vld [vmem:[#allocation2 + $0x1e0] sm:$0xff] }
  0xe4   :  { %542 = vmatprep.mubr.f32.mxu1 %v3872_v15  ;;  %v1852_v15 = vld [vmem:[#allocation7 + $0x1f0] sm:$0xff]  ;;  %2895 = vmatprep.subr.bf16.mxu0 %v2894_v58  ;;  %v1861_v58 = vld [vmem:[#allocation7 + $0x238] sm:$0xff] }
  0xe5   :  { %v2896_v62 = vpack.c.bf16 %v1852_v15, %v1850_v18  ;;  %v3900_v15 = vld [vmem:[#allocation2 + $0x1f0] sm:$0xff] }
  0xe7   :  { %543 = vmatmul.mubr.f32.gmra.mrb[54].mxu1 %v3876_v32  ;;  %2897 = vmatpush1.bf16.msra.mxu0 %v2896_v62  ;;  %v1855_v62 = vld [vmem:[#allocation7 + $0x208] sm:$0xff] }
  0xe8   :  { %548 = vmatprep.mubr.f32.mxu1 %v3878_v48  ;;  %v2898_v61 = vpack.c.bf16 %v1857_v53, %v1855_v62 }
  0xea   :  { %2899 = vmatprep.subr.bf16.mxu0 %v2898_v61 }
  0xeb   :  { %549 = vmatmul.mubr.f32.gmra.mrb[56].mxu1 %v3882_v16 }
  0xec   :  { %554 = vmatprep.mubr.f32.mxu1 %v3884_v10 }
  0xef   :  { %555 = vmatmul.mubr.f32.gmra.mrb[58].mxu1 %v3888_v36 }
  0xf0   :  { %560 = vmatprep.mubr.f32.mxu1 %v3890_v34 }
  0xf3   :  { %561 = vmatmul.mubr.f32.gmra.mrb[60].mxu1 %v3894_v28 }
  0xf4   :  { %566 = vmatprep.mubr.f32.mxu1 %v3896_v38 }
  0xf7   :  { %567 = vmatmul.mubr.f32.gmra.mrb[62].mxu1 %v3900_v15 }
  0xf8   :  { %637 = vmatprep.mubr.f32.mxu1 %v3711_v41 }
  0xfb   :  { %638 = vmatmul.mubr.f32.vlgmr.msra.gmra.mrb[64].mxu1 %v3714_v40 }
  0xfc   :  { %643 = vmatprep.mubr.f32.mxu1 %v3716_v43 }
  0xff   :  { %644 = vmatmul.mubr.f32.gmra.mrb[66].mxu1 %v3720_v49 }
 0x100   :  { %649 = vmatprep.mubr.f32.mxu1 %v3722_v51 }
 0x103   :  { %650 = vmatmul.mubr.f32.gmra.mrb[68].mxu1 %v3726_v57 }
 0x104   :  { %655 = vmatprep.mubr.f32.mxu1 %v3728_v59 }
 0x107   :  { %656 = vmatmul.mubr.f32.gmra.mrb[70].mxu1 %v3732_v1 }
 0x108   :  { %661 = vmatprep.mubr.f32.mxu1 %v3734_v3 }
 0x10b   :  { %662 = vmatmul.mubr.f32.gmra.mrb[72].mxu1 %v3738_v9 }
 0x10c   :  { %667 = vmatprep.mubr.f32.mxu1 %v3740_v11 }
 0x10f   :  { %668 = vmatmul.mubr.f32.gmra.mrb[74].mxu1 %v3744_v17 }
 0x110   :  { %673 = vmatprep.mubr.f32.mxu1 %v3746_v19  ;;  %v4512_v19 = vld [vmem:[#allocation12_spill] sm:$0xff] }
 0x113   :  { %674 = vmatmul.mubr.f32.gmra.mrb[76].mxu1 %v3750_v25 }
 0x114   :  { %679 = vmatprep.mubr.f32.mxu1 %v3752_v27 }
 0x117   :  { %680 = vmatmul.mubr.f32.gmra.mrb[78].mxu1 %v3756_v33 }
 0x118   :  { %685 = vmatprep.mubr.f32.mxu1 %v3758_v35 }
 0x11b   :  { %686 = vmatmul.mubr.f32.gmra.mrb[80].mxu1 %v3762_v44  ;;  %v4513_v44 = vld [vmem:[#allocation13_spill] sm:$0xff] }
 0x11c   :  { %691 = vmatprep.mubr.f32.mxu1 %v3764_v46 }
 0x11f   :  { %692 = vmatmul.mubr.f32.gmra.mrb[82].mxu1 %v3768_v54 }
 0x120   :  { %697 = vmatprep.mubr.f32.mxu1 %v3770_v56 }
 0x123   :  { %698 = vmatmul.mubr.f32.gmra.mrb[84].mxu1 %v3774_v0  ;;  %v4514_v0 = vld [vmem:[#allocation14_spill] sm:$0xff] }
 0x124   :  { %703 = vmatprep.mubr.f32.mxu1 %v3776_v4 }
 0x127   :  { %704 = vmatmul.mubr.f32.gmra.mrb[86].mxu1 %v3780_v12 }
 0x128   :  { %709 = vmatprep.mubr.f32.mxu1 %v3782_v14 }
 0x12b   :  { %710 = vmatmul.mubr.f32.gmra.mrb[88].mxu1 %v3786_v22 }
 0x12c   :  { %715 = vmatprep.mubr.f32.mxu1 %v3788_v23 }
 0x12f   :  { %716 = vmatmul.mubr.f32.gmra.mrb[90].mxu1 %v3792_v39  ;;  %v4515_v39 = vld [vmem:[#allocation15_spill] sm:$0xff] }
 0x130   :  { %721 = vmatprep.mubr.f32.mxu1 %v3794_v42 }
 0x133   :  { %722 = vmatmul.mubr.f32.gmra.mrb[92].mxu1 %v3798_v2 }
 0x134   :  { %727 = vmatprep.mubr.f32.mxu1 %v3800_v7 }
 0x137   :  { %728 = vmatmul.mubr.f32.gmra.mrb[94].mxu1 %v3804_v24  ;;  %v4516_v24 = vld [vmem:[#allocation16_spill] sm:$0xff] }
 0x138   :  { %733 = vmatprep.mubr.f32.mxu1 %v3806_v29 }
 0x13b   :  { %734 = vmatmul.mubr.f32.gmra.mrb[96].mxu1 %v3810_v37 }
 0x13c   :  { %739 = vmatprep.mubr.f32.mxu1 %v3812_v45 }
 0x13f   :  { %740 = vmatmul.mubr.f32.gmra.mrb[98].mxu1 %v3816_v55 }
 0x140   :  { %745 = vmatprep.mubr.f32.mxu1 %v3818_v60 }
 0x143   :  { %746 = vmatmul.mubr.f32.gmra.mrb[100].mxu1 %v3822_v8  ;;  %v4517_v8 = vld [vmem:[#allocation17_spill] sm:$0xff] }
 0x144   :  { %751 = vmatprep.mubr.f32.mxu1 %v3824_v13 }
 0x147   :  { %752 = vmatmul.mubr.f32.gmra.mrb[102].mxu1 %v3828_v26 }
 0x148   :  { %757 = vmatprep.mubr.f32.mxu1 %v3830_v30 }
 0x14b   :  { %758 = vmatmul.mubr.f32.gmra.mrb[104].mxu1 %v3834_v47  ;;  %v4518_v47 = vld [vmem:[#allocation18_spill] sm:$0xff] }
 0x14c   :  { %763 = vmatprep.mubr.f32.mxu1 %v3836_v50 }
 0x14e   :  { %v3946_v41 = vpop.f32.mrb[0].mxu1 }
 0x14f   :  { %v2578_v40 = vmul.f32 -1.442695, %v3946_v41  ;;  %v3949_v43 = vpop.f32.mrb[1].mxu1  ;;  %764 = vmatmul.mubr.f32.gmra.mrb[106].mxu1 %v3840_v63 }
 0x150   :  { %v2579_v49 = vmul.f32 -1.442695, %v3949_v43  ;;  %769 = vmatprep.mubr.f32.mxu1 %v3842_v6  ;;  %v1854_v6 = vld [vmem:[#allocation7 + $0x200] sm:$0xff] }
 0x151   :  { %3035 = vpow2.f32 %v2578_v40 }
 0x152   :  { %3037 = vpow2.f32 %v2579_v49  ;;  %v3954_v51 = vpop.f32.mrb[2].mxu1 }
 0x153   :  { %v2582_v57 = vmul.f32 -1.442695, %v3954_v51  ;;  %v3957_v59 = vpop.f32.mrb[3].mxu1  ;;  %770 = vmatmul.mubr.f32.gmra.mrb[108].mxu1 %v3846_v21 }
 0x154   :  { %v2583_v1 = vmul.f32 -1.442695, %v3957_v59  ;;  %775 = vmatprep.mubr.f32.mxu1 %v3848_v31 }
 0x155   :  { %3039 = vpow2.f32 %v2582_v57 }
 0x156   :  { %3041 = vpow2.f32 %v2583_v1  ;;  %v3962_v3 = vpop.f32.mrb[4].mxu1  ;;  %v2900_v1 = vpack.c.bf16 %v1856_v20, %v1854_v6 }
 0x157   :  { %v2586_v9 = vmul.f32 -1.442695, %v3962_v3  ;;  %v3965_v11 = vpop.f32.mrb[5].mxu1  ;;  %776 = vmatmul.mubr.f32.gmra.mrb[110].mxu1 %v3852_v52 }
 0x158   :  { %v2587_v17 = vmul.f32 -1.442695, %v3965_v11  ;;  %781 = vmatprep.mubr.f32.mxu1 %v4512_v19 }
 0x159   :  { %3043 = vpow2.f32 %v2586_v9  ;;  %v2902_v9 = vpack.c.bf16 %v1861_v58, %v1859_v5  ;;  %v1866_v58 = vld [vmem:[#allocation7 + $0x260] sm:$0xff] }
 0x15a   :  { %3045 = vpow2.f32 %v2587_v17  ;;  %v3970_v25 = vpop.f32.mrb[6].mxu1  ;;  %v1860_v17 = vld [vmem:[#allocation7 + $0x230] sm:$0xff] }
 0x15b   :  { %v3036_v27 = vpop.eup %3035  ;;  %v2590_v33 = vmul.f32 -1.442695, %v3970_v25  ;;  %v3973_v35 = vpop.f32.mrb[7].mxu1  ;;  %782 = vmatmul.mubr.f32.gmra.mrb[112].mxu1 %v4513_v44 }
 0x15c   :  { %v3038_v46 = vpop.eup %3037  ;;  %v1214_v54 = vadd.f32 1.0, %v3036_v27  ;;  %v2591_v56 = vmul.f32 -1.442695, %v3973_v35  ;;  %787 = vmatprep.mubr.f32.mxu1 %v4514_v0 }
 0x15d   :  { %v1215_v4 = vadd.f32 1.0, %v3038_v46  ;;  %3047 = vpow2.f32 %v2590_v33 }
 0x15e   :  { %3049 = vrcp.f32 %v1214_v54  ;;  %v3978_v12 = vpop.f32.mrb[8].mxu1  ;;  %v1865_v54 = vld [vmem:[#allocation7 + $0x258] sm:$0xff] }
 0x15f   :  { %v3040_v14 = vpop.eup %3039  ;;  %3051 = vrcp.f32 %v1215_v4  ;;  %v2594_v22 = vmul.f32 -1.442695, %v3978_v12  ;;  %v3981_v23 = vpop.f32.mrb[9].mxu1  ;;  %788 = vmatmul.mubr.f32.gmra.mrb[114].mxu1 %v4515_v39 }
 0x160   :  { %v3042_v42 = vpop.eup %3041  ;;  %v1218_v2 = vadd.f32 1.0, %v3040_v14  ;;  %3053 = vpow2.f32 %v2591_v56  ;;  %v2595_v7 = vmul.f32 -1.442695, %v3981_v23  ;;  %793 = vmatprep.mubr.f32.mxu1 %v4516_v24 }
 0x161   :  { %v1219_v29 = vadd.f32 1.0, %v3042_v42  ;;  %3055 = vpow2.f32 %v2594_v22  ;;  %v1862_v42 = vld [vmem:[#allocation7 + $0x240] sm:$0xff] }
 0x162   :  { %3057 = vrcp.f32 %v1218_v2  ;;  %v3986_v37 = vpop.f32.mrb[10].mxu1  ;;  %v1864_v2 = vld [vmem:[#allocation7 + $0x250] sm:$0xff] }
 0x163   :  { %v3044_v45 = vpop.eup %3043  ;;  %3059 = vrcp.f32 %v1219_v29  ;;  %v2598_v55 = vmul.f32 -1.442695, %v3986_v37  ;;  %v3989_v60 = vpop.f32.mrb[11].mxu1  ;;  %794 = vmatmul.mubr.f32.gmra.mrb[116].mxu1 %v4517_v8 }
 0x164   :  { %v3046_v13 = vpop.eup %3045  ;;  %v1222_v26 = vadd.f32 1.0, %v3044_v45  ;;  %3061 = vpow2.f32 %v2595_v7  ;;  %v2599_v30 = vmul.f32 -1.442695, %v3989_v60  ;;  %799 = vmatprep.mubr.f32.mxu1 %v4518_v47 }
 0x165   :  { %v1223_v50 = vadd.f32 1.0, %v3046_v13  ;;  %3063 = vpow2.f32 %v2598_v55  ;;  %v1869_v55 = vld [vmem:[#allocation7 + $0x278] sm:$0xff] }
 0x166   :  { %3065 = vrcp.f32 %v1222_v26  ;;  %v3994_v63 = vpop.f32.mrb[12].mxu1 }
 0x167   :  { %v3048_v21 = vpop.eup %3047  ;;  %3067 = vrcp.f32 %v1223_v50  ;;  %v2602_v31 = vmul.f32 -1.442695, %v3994_v63  ;;  %v3997_v52 = vpop.f32.mrb[13].mxu1  ;;  %800 = vmatmul.mubr.f32.gmra.mrb[118].mxu1 %v3876_v32  ;;  %v1858_v32 = vld [vmem:[#allocation7 + $0x220] sm:$0xff] }
 0x168   :  { %v3050_v18 = vpop.eup %3049  ;;  %v1226_v62 = vadd.f32 1.0, %v3048_v21  ;;  %3069 = vpow2.f32 %v2599_v30  ;;  %v2603_v53 = vmul.f32 -1.442695, %v3997_v52  ;;  %805 = vmatprep.mubr.f32.mxu1 %v3878_v48  ;;  %v1863_v48 = vld [vmem:[#allocation7 + $0x248] sm:$0xff] }
 0x169   :  { %v3052_v61 = vpop.eup %3051  ;;  %3071 = vpow2.f32 %v2602_v31  ;;  %v1598_v27 = vmul.f32 %v3050_v18, %v3946_v41  ;;  %v2906_v39 = vpack.c.bf16 %v1865_v54, %v1863_v48  ;;  %v1875_v54 = vld [vmem:[#allocation7 + $0x2a8] sm:$0xff] }
 0x16a   :  { %v3054_v40 = vpop.eup %3053  ;;  %v4002_v49 = vpop.f32.mrb[14].mxu1  ;;  %v1599_v57 = vmul.f32 %v3052_v61, %v3949_v43  ;;  %3073 = vpow2.f32 %v2603_v53  ;;  %v1873_v53 = vld [vmem:[#allocation7 + $0x298] sm:$0xff] }
 0x16b   :  { %v3056_v19 = vpop.eup %3055  ;;  %v1227_v33 = vadd.f32 1.0, %v3054_v40  ;;  %v2606_v44 = vmul.f32 -1.442695, %v4002_v49  ;;  %v4007_v46 = vpop.f32.mrb[15].mxu1  ;;  %806 = vmatmul.mubr.f32.gmra.mrb[120].mxu1 %v3882_v16  ;;  %3075 = vrcp.f32 %v1226_v62  ;;  %v2904_v16 = vpack.c.bf16 %v1860_v17, %v1858_v32  ;;  %v1871_v62 = vld [vmem:[#allocation7 + $0x288] sm:$0xff] }
 0x16c   :  { %v3058_v56 = vpop.eup %3057  ;;  %v1230_v43 = vadd.f32 1.0, %v3056_v19  ;;  %v2607_v0 = vmul.f32 -1.442695, %v4007_v46  ;;  %1982 = vmatprep.mubr.f32.mxu0 %v1599_v57  ;;  %811 = vmatprep.mubr.f32.mxu1 %v3884_v10  ;;  %v1870_v19 = vld [vmem:[#allocation7 + $0x280] sm:$0xff] }
 0x16d   :  { %v3060_v4 = vpop.eup %3059  ;;  %3077 = vrcp.f32 %v1227_v33  ;;  %1983 = vmatmul.mubr.f32.vlgmr.msra.gmra.mrb[0].mxu0 %v1598_v27  ;;  %v1602_v24 = vmul.f32 %v3058_v56, %v3954_v51  ;;  %v1872_v27 = vld [vmem:[#allocation7 + $0x290] sm:$0xff]  ;;  %v1877_v56 = vld [vmem:[#allocation7 + $0x2b8] sm:$0xff] }
 0x16e   :  { %v3062_v41 = vpop.eup %3061  ;;  %v1603_v14 = vmul.f32 %v3060_v4, %v3957_v59  ;;  %3079 = vrcp.f32 %v1230_v43  ;;  %v4013_v22 = vpop.f32.mrb[16].mxu1  ;;  %2901 = vmatpush1.bf16.msra.mxu0 %v2900_v1  ;;  %v1867_v59 = vld [vmem:[#allocation7 + $0x268] sm:$0xff] }
 0x16f   :  { %v3064_v7 = vpop.eup %3063  ;;  %v1231_v29 = vadd.f32 1.0, %v3062_v41  ;;  %3081 = vpow2.f32 %v2606_v44  ;;  %v2610_v10 = vmul.f32 -1.442695, %v4013_v22  ;;  %v4017_v45 = vpop.f32.mrb[17].mxu1  ;;  %812 = vmatmul.mubr.f32.gmra.mrb[122].mxu1 %v3888_v36  ;;  %2903 = vmatprep.subr.bf16.mxu0 %v2902_v9  ;;  %v2908_v36 = vpack.c.bf16 %v1864_v2, %v1862_v42 }
 0x170   :  { %v3066_v8 = vpop.eup %3065  ;;  %v1234_v13 = vadd.f32 1.0, %v3064_v7  ;;  %3083 = vpow2.f32 %v2607_v0  ;;  %v2611_v26 = vmul.f32 -1.442695, %v4017_v45  ;;  %1988 = vmatprep.mubr.f32.mxu0 %v1603_v14  ;;  %817 = vmatprep.mubr.f32.mxu1 %v3890_v34  ;;  %v2910_v6 = vpack.c.bf16 %v1869_v55, %v1867_v59  ;;  %v1876_v7 = vld [vmem:[#allocation7 + $0x2b0] sm:$0xff]  ;;  %v1879_v59 = vld [vmem:[#allocation7 + $0x2c8] sm:$0xff]  ;;  %v1881_v55 = vld [vmem:[#allocation7 + $0x2d8] sm:$0xff] }
 0x171   :  { %v3068_v51 = vpop.eup %3067  ;;  %3085 = vrcp.f32 %v1231_v29  ;;  %1989 = vmatmul.mubr.f32.gmra.mrb[2].mxu0 %v1602_v24  ;;  %v1606_v31 = vmul.f32 %v3066_v8, %v3962_v3  ;;  %v2916_v14 = vpack.c.bf16 %v1872_v27, %v1870_v19  ;;  %v2918_v2 = vpack.c.bf16 %v1877_v56, %v1875_v54  ;;  %v1882_v19 = vld [vmem:[#allocation7 + $0x2e0] sm:$0xff]  ;;  %v1884_v27 = vld [vmem:[#allocation7 + $0x2f0] sm:$0xff]  ;;  %v1889_v54 = vld [vmem:[#allocation7 + $0x318] sm:$0xff] }
 0x172   :  { %v3070_v30 = vpop.eup %3069  ;;  %v1607_v47 = vmul.f32 %v3068_v51, %v3965_v11  ;;  %3087 = vrcp.f32 %v1234_v13  ;;  %v4023_v50 = vpop.f32.mrb[18].mxu1  ;;  %2905 = vmatpush1.bf16.msra.mxu0 %v2904_v16  ;;  %v1868_v11 = vld [vmem:[#allocation7 + $0x270] sm:$0xff] }
 0x173   :  { %v3072_v21 = vpop.eup %3071  ;;  %v1235_v20 = vadd.f32 1.0, %v3070_v30  ;;  %3089 = vpow2.f32 %v2610_v10  ;;  %v2614_v5 = vmul.f32 -1.442695, %v4023_v50  ;;  %v4027_v34 = vpop.f32.mrb[19].mxu1  ;;  %818 = vmatmul.mubr.f32.gmra.mrb[124].mxu1 %v3894_v28  ;;  %2907 = vmatprep.subr.bf16.mxu0 %v2906_v39  ;;  %v2912_v28 = vpack.c.bf16 %v1868_v11, %v1866_v58 }
 0x174   :  { %v1238_v18 = vadd.f32 1.0, %v3072_v21  ;;  %3091 = vpow2.f32 %v2611_v26  ;;  %1994 = vmatprep.mubr.f32.mxu0 %v1607_v47  ;;  %823 = vmatprep.mubr.f32.mxu1 %v3896_v38  ;;  %v3074_v61 = vpop.eup %3073  ;;  %v2615_v3 = vmul.f32 -1.442695, %v4027_v34  ;;  %v2914_v38 = vpack.c.bf16 %v1873_v53, %v1871_v62  ;;  %v1885_v62 = vld [vmem:[#allocation7 + $0x2f8] sm:$0xff] }
 0x175   :  { %3093 = vrcp.f32 %v1235_v20  ;;  %1995 = vmatmul.mubr.f32.gmra.mrb[4].mxu0 %v1606_v31  ;;  %v3076_v40 = vpop.eup %3075  ;;  %v1239_v57 = vadd.f32 1.0, %v3074_v61  ;;  %v2922_v31 = vpack.c.bf16 %v1881_v55, %v1879_v59  ;;  %v1880_v20 = vld [vmem:[#allocation7 + $0x2d0] sm:$0xff]  ;;  %v1893_v59 = vld [vmem:[#allocation7 + $0x338] sm:$0xff] }
 0x176   :  { %3095 = vrcp.f32 %v1238_v18  ;;  %v4032_v1 = vpop.f32.mrb[20].mxu1  ;;  %2909 = vmatpush1.bf16.msra.mxu0 %v2908_v36  ;;  %v1610_v0 = vmul.f32 %v3076_v40, %v3970_v25  ;;  %v1874_v25 = vld [vmem:[#allocation7 + $0x2a0] sm:$0xff]  ;;  %v1883_v18 = vld [vmem:[#allocation7 + $0x2e8] sm:$0xff] }
 0x177   :  { %v3078_v9 = vpop.eup %3077  ;;  %3097 = vpow2.f32 %v2614_v5  ;;  %v2618_v32 = vmul.f32 -1.442695, %v4032_v1  ;;  %v4035_v17 = vpop.f32.mrb[21].mxu1  ;;  %824 = vmatmul.mubr.f32.gmra.mrb[126].mxu1 %v3900_v15  ;;  %2911 = vmatprep.subr.bf16.mxu0 %v2910_v6  ;;  %v2920_v47 = vpack.c.bf16 %v1876_v7, %v1874_v25  ;;  %v1886_v25 = vld [vmem:[#allocation7 + $0x300] sm:$0xff]  ;;  %v1888_v7 = vld [vmem:[#allocation7 + $0x310] sm:$0xff] }
 0x178   :  { %v3080_v33 = vpop.eup %3079  ;;  %v1611_v44 = vmul.f32 %v3078_v9, %v3973_v35  ;;  %3099 = vrcp.f32 %v1239_v57  ;;  %v2619_v48 = vmul.f32 -1.442695, %v4035_v17 }
 0x179   :  { %v3082_v43 = vpop.eup %3081  ;;  %3101 = vpow2.f32 %v2615_v3  ;;  %v1614_v13 = vmul.f32 %v3080_v33, %v3978_v12  ;;  %v1878_v12 = vld [vmem:[#allocation7 + $0x2c0] sm:$0xff] }
 0x17a   :  { %v3084_v4 = vpop.eup %3083  ;;  %v1242_v41 = vadd.f32 1.0, %v3082_v43  ;;  %3103 = vpow2.f32 %v2618_v32  ;;  %2000 = vmatprep.mubr.f32.mxu0 %v1611_v44  ;;  %v4041_v15 = vpop.f32.mrb[22].mxu1  ;;  %2913 = vmatpush1.bf16.msra.mxu0 %v2912_v28  ;;  %v2924_v28 = vpack.c.bf16 %v1880_v20, %v1878_v12  ;;  %v1890_v12 = vld [vmem:[#allocation7 + $0x320] sm:$0xff]  ;;  %v1892_v20 = vld [vmem:[#allocation7 + $0x330] sm:$0xff] }
 0x17b   :  { %v3086_v16 = vpop.eup %3085  ;;  %v1243_v39 = vadd.f32 1.0, %v3084_v4  ;;  %3105 = vpow2.f32 %v2619_v48  ;;  %2001 = vmatmul.mubr.f32.gmra.mrb[6].mxu0 %v1610_v0  ;;  %v2622_v35 = vmul.f32 -1.442695, %v4041_v15  ;;  %v4044_v42 = vpop.f32.mrb[23].mxu1  ;;  %2915 = vmatprep.subr.bf16.mxu0 %v2914_v38  ;;  %v1887_v48 = vld [vmem:[#allocation7 + $0x308] sm:$0xff] }
 0x17c   :  { %v3088_v24 = vpop.eup %3087  ;;  %v1615_v29 = vmul.f32 %v3086_v16, %v3981_v23  ;;  %3107 = vrcp.f32 %v1242_v41  ;;  %v2623_v10 = vmul.f32 -1.442695, %v4044_v42  ;;  %v2928_v16 = vpack.c.bf16 %v1884_v27, %v1882_v19  ;;  %v1894_v19 = vld [vmem:[#allocation7 + $0x340] sm:$0xff]  ;;  %v1896_v27 = vld [vmem:[#allocation7 + $0x350] sm:$0xff] }
 0x17d   :  { %v3090_v8 = vpop.eup %3089  ;;  %3109 = vrcp.f32 %v1243_v39  ;;  %v1618_v61 = vmul.f32 %v3088_v24, %v3986_v37  ;;  %v2926_v37 = vpack.c.bf16 %v1885_v62, %v1883_v18  ;;  %v1897_v18 = vld [vmem:[#allocation7 + $0x358] sm:$0xff] }
 0x17e   :  { %v3092_v26 = vpop.eup %3091  ;;  %v1246_v51 = vadd.f32 1.0, %v3090_v8  ;;  %3111 = vpow2.f32 %v2622_v35  ;;  %2006 = vmatprep.mubr.f32.mxu0 %v1615_v29  ;;  %v4049_v30 = vpop.f32.mrb[24].mxu1  ;;  %2917 = vmatpush1.bf16.msra.mxu0 %v2916_v14 }
 0x17f   :  { %v3094_v36 = vpop.eup %3093  ;;  %v1247_v6 = vadd.f32 1.0, %v3092_v26  ;;  %3113 = vpow2.f32 %v2623_v10  ;;  %2007 = vmatmul.mubr.f32.gmra.mrb[8].mxu0 %v1614_v13  ;;  %v2626_v23 = vmul.f32 -1.442695, %v4049_v30  ;;  %v4052_v21 = vpop.f32.mrb[25].mxu1  ;;  %2919 = vmatprep.subr.bf16.mxu0 %v2918_v2  ;;  %v1891_v10 = vld [vmem:[#allocation7 + $0x328] sm:$0xff] }
 0x180   :  { %v3096_v5 = vpop.eup %3095  ;;  %v1619_v58 = vmul.f32 %v3094_v36, %v3989_v60  ;;  %3115 = vrcp.f32 %v1246_v51  ;;  %v2627_v11 = vmul.f32 -1.442695, %v4052_v21 }
 0x181   :  { %v3098_v53 = vpop.eup %3097  ;;  %3117 = vrcp.f32 %v1247_v6  ;;  %v1622_v43 = vmul.f32 %v3096_v5, %v3994_v63  ;;  %v2930_v63 = vpack.c.bf16 %v1889_v54, %v1887_v48  ;;  %v2932_v6 = vpack.c.bf16 %v1888_v7, %v1886_v25  ;;  %v1899_v54 = vld [vmem:[#allocation7 + $0x368] sm:$0xff]  ;;  %v1898_v7 = vld [vmem:[#allocation7 + $0x360] sm:$0xff] }
 0x182   :  { %v3100_v3 = vpop.eup %3099  ;;  %v1250_v40 = vadd.f32 1.0, %v3098_v53  ;;  %3119 = vpow2.f32 %v2626_v23  ;;  %2012 = vmatprep.mubr.f32.mxu0 %v1619_v58  ;;  %v4057_v57 = vpop.f32.mrb[26].mxu1  ;;  %2921 = vmatpush1.bf16.msra.mxu0 %v2920_v47 }
 0x183   :  { %v3102_v9 = vpop.eup %3101  ;;  %v1623_v60 = vmul.f32 %v3100_v3, %v3997_v52  ;;  %3121 = vpow2.f32 %v2627_v11  ;;  %2013 = vmatmul.mubr.f32.gmra.mrb[10].mxu0 %v1618_v61  ;;  %v2630_v32 = vmul.f32 -1.442695, %v4057_v57  ;;  %v4061_v38 = vpop.f32.mrb[27].mxu1  ;;  %2923 = vmatprep.subr.bf16.mxu0 %v2922_v31  ;;  %v1895_v11 = vld [vmem:[#allocation7 + $0x348] sm:$0xff] }
 0x184   :  { %v3104_v33 = vpop.eup %3103  ;;  %3123 = vrcp.f32 %v1250_v40  ;;  %v1251_v44 = vadd.f32 1.0, %v3102_v9  ;;  %v2631_v52 = vmul.f32 -1.442695, %v4061_v38 }
 0x185   :  { %v3106_v56 = vpop.eup %3105  ;;  %v1254_v0 = vadd.f32 1.0, %v3104_v33  ;;  %3125 = vpow2.f32 %v2630_v32  ;;  %2018 = vmatprep.mubr.f32.mxu0 %v1623_v60  ;;  %v2936_v60 = vpack.c.bf16 %v1892_v20, %v1890_v12  ;;  %v1902_v20 = vld [vmem:[#allocation7 + $0x380] sm:$0xff] }
 0x186   :  { %v3108_v4 = vpop.eup %3107  ;;  %3127 = vrcp.f32 %v1251_v44  ;;  %v1255_v41 = vadd.f32 1.0, %v3106_v56  ;;  %v4065_v14 = vpop.f32.mrb[28].mxu1  ;;  %2925 = vmatpush1.bf16.msra.mxu0 %v2924_v28  ;;  %v1901_v56 = vld [vmem:[#allocation7 + $0x378] sm:$0xff] }
 0x187   :  { %v3110_v39 = vpop.eup %3109  ;;  %3129 = vrcp.f32 %v1254_v0  ;;  %2019 = vmatmul.mubr.f32.gmra.mrb[12].mxu0 %v1622_v43  ;;  %v2634_v35 = vmul.f32 -1.442695, %v4065_v14  ;;  %v4068_v2 = vpop.f32.mrb[29].mxu1  ;;  %2927 = vmatprep.subr.bf16.mxu0 %v2926_v37  ;;  %v1626_v8 = vmul.f32 %v3108_v4, %v4002_v49  ;;  %v2934_v49 = vpack.c.bf16 %v1893_v59, %v1891_v10  ;;  %v1903_v59 = vld [vmem:[#allocation7 + $0x388] sm:$0xff] }
 0x188   :  { %v3112_v24 = vpop.eup %3111  ;;  %v1627_v29 = vmul.f32 %v3110_v39, %v4007_v46  ;;  %3131 = vrcp.f32 %v1255_v41  ;;  %v2635_v26 = vmul.f32 -1.442695, %v4068_v2 }
 0x189   :  { %v3114_v55 = vpop.eup %3113  ;;  %v1258_v13 = vadd.f32 1.0, %v3112_v24  ;;  %3133 = vpow2.f32 %v2631_v52  ;;  %v1900_v24 = vld [vmem:[#allocation7 + $0x370] sm:$0xff] }
 0x18a   :  { %v3116_v51 = vpop.eup %3115  ;;  %v1259_v47 = vadd.f32 1.0, %v3114_v55  ;;  %3135 = vpow2.f32 %v2634_v35  ;;  %2024 = vmatprep.mubr.f32.mxu0 %v1627_v29  ;;  %v4073_v36 = vpop.f32.mrb[30].mxu1  ;;  %2929 = vmatpush1.bf16.msra.mxu0 %v2928_v16  ;;  %v2940_v16 = vpack.c.bf16 %v1896_v27, %v1894_v19  ;;  %v1905_v55 = vld [vmem:[#allocation7 + $0x398] sm:$0xff]  ;;  %v1906_v27 = vld [vmem:[#allocation7 + $0x3a0] sm:$0xff] }
 0x18b   :  { %v3118_v23 = vpop.eup %3117  ;;  %3137 = vrcp.f32 %v1258_v13  ;;  %2025 = vmatmul.mubr.f32.gmra.mrb[14].mxu0 %v1626_v8  ;;  %v2638_v46 = vmul.f32 -1.442695, %v4073_v36  ;;  %v4076_v31 = vpop.f32.mrb[31].mxu1  ;;  %2931 = vmatprep.subr.bf16.mxu0 %v2930_v63  ;;  %v1630_v53 = vmul.f32 %v3116_v51, %v4013_v22  ;;  %v2938_v22 = vpack.c.bf16 %v1897_v18, %v1895_v11  ;;  %v1907_v18 = vld [vmem:[#allocation7 + $0x3a8] sm:$0xff] }
 0x18c   :  { %v3120_v5 = vpop.eup %3119  ;;  %v1631_v58 = vmul.f32 %v3118_v23, %v4017_v45  ;;  %3139 = vrcp.f32 %v1259_v47  ;;  %v2639_v3 = vmul.f32 -1.442695, %v4076_v31  ;;  %v2944_v47 = vpack.c.bf16 %v1900_v24, %v1898_v7  ;;  %v1910_v24 = vld [vmem:[#allocation7 + $0x3c0] sm:$0xff] }
 0x18d   :  { %v3122_v62 = vpop.eup %3121  ;;  %v1262_v61 = vadd.f32 1.0, %v3120_v5  ;;  %3141 = vpow2.f32 %v2635_v26  ;;  %v2946_v12 = vpack.c.bf16 %v1905_v55, %v1903_v59  ;;  %v1904_v5 = vld [vmem:[#allocation7 + $0x390] sm:$0xff]  ;;  %v1915_v59 = vld [vmem:[#allocation7 + $0x3e8] sm:$0xff]  ;;  %v1917_v55 = vld [vmem:[#allocation7 + $0x3f8] sm:$0xff] }
 0x18e   :  { %v3124_v40 = vpop.eup %3123  ;;  %v1263_v28 = vadd.f32 1.0, %v3122_v62  ;;  %3143 = vpow2.f32 %v2638_v46  ;;  %2030 = vmatprep.mubr.f32.mxu0 %v1631_v58  ;;  %v4081_v9 = vpop.f32.mrb[32].mxu1  ;;  %2933 = vmatpush1.bf16.msra.mxu0 %v2932_v6  ;;  %v1909_v62 = vld [vmem:[#allocation7 + $0x3b8] sm:$0xff] }
 0x18f   :  { %v3126_v32 = vpop.eup %3125  ;;  %3145 = vrcp.f32 %v1262_v61  ;;  %2031 = vmatmul.mubr.f32.gmra.mrb[16].mxu0 %v1630_v53  ;;  %v2642_v45 = vmul.f32 -1.442695, %v4081_v9  ;;  %v4084_v37 = vpop.f32.mrb[33].mxu1  ;;  %2935 = vmatprep.subr.bf16.mxu0 %v2934_v49  ;;  %v1634_v4 = vmul.f32 %v3124_v40, %v4023_v50  ;;  %v2950_v19 = vpack.c.bf16 %v1909_v62, %v1907_v18 }
 0x190   :  { %v3128_v33 = vpop.eup %3127  ;;  %3147 = vrcp.f32 %v1263_v28  ;;  %v1266_v44 = vadd.f32 1.0, %v3126_v32  ;;  %v2643_v48 = vmul.f32 -1.442695, %v4084_v37  ;;  %v2948_v28 = vpack.c.bf16 %v1904_v5, %v1902_v20 }
 0x191   :  { %v3130_v43 = vpop.eup %3129  ;;  %v1635_v0 = vmul.f32 %v3128_v33, %v4027_v34  ;;  %3149 = vpow2.f32 %v2639_v3  ;;  %v2942_v34 = vpack.c.bf16 %v1901_v56, %v1899_v54  ;;  %v1908_v33 = vld [vmem:[#allocation7 + $0x3b0] sm:$0xff]  ;;  %v1911_v54 = vld [vmem:[#allocation7 + $0x3c8] sm:$0xff]  ;;  %v1913_v56 = vld [vmem:[#allocation7 + $0x3d8] sm:$0xff]  ;;  %v2958_v5 = vpack.c.bf16 %v1917_v55, %v1915_v59 }
 0x192   :  { %v3132_v52 = vpop.eup %3131  ;;  %3151 = vrcp.f32 %v1266_v44  ;;  %v4089_v41 = vpop.f32.mrb[34].mxu1  ;;  %2937 = vmatpush1.bf16.msra.mxu0 %v2936_v60  ;;  %v1638_v26 = vmul.f32 %v3130_v43, %v4032_v1  ;;  %v2954_v7 = vpack.c.bf16 %v1913_v56, %v1911_v54 }
 0x193   :  { %v3134_v39 = vpop.eup %3133  ;;  %v1639_v35 = vmul.f32 %v3132_v52, %v4035_v17  ;;  %3153 = vpow2.f32 %v2642_v45  ;;  %2036 = vmatprep.mubr.f32.mxu0 %v1635_v0  ;;  %v2646_v63 = vmul.f32 -1.442695, %v4089_v41  ;;  %v4093_v25 = vpop.f32.mrb[35].mxu1  ;;  %2939 = vmatprep.subr.bf16.mxu0 %v2938_v22 }
 0x194   :  { %v3136_v29 = vpop.eup %3135  ;;  %v1267_v50 = vadd.f32 1.0, %v3134_v39  ;;  %3155 = vpow2.f32 %v2643_v48  ;;  %2037 = vmatmul.mubr.f32.gmra.mrb[18].mxu0 %v1634_v4  ;;  %v2647_v10 = vmul.f32 -1.442695, %v4093_v25 }
 0x195   :  { %v3138_v8 = vpop.eup %3137  ;;  %v1270_v17 = vadd.f32 1.0, %v3136_v29  ;;  %3157 = vpow2.f32 %v2646_v63  ;;  %2042 = vmatprep.mubr.f32.mxu0 %v1639_v35  ;;  %v1912_v29 = vld [vmem:[#allocation7 + $0x3d0] sm:$0xff] }
 0x196   :  { %v3140_v13 = vpop.eup %3139  ;;  %3159 = vrcp.f32 %v1267_v50  ;;  %v4097_v51 = vpop.f32.mrb[36].mxu1  ;;  %2941 = vmatpush1.bf16.msra.mxu0 %v2940_v16  ;;  %v1642_v3 = vmul.f32 %v3138_v8, %v4041_v15  ;;  %v2952_v16 = vpack.c.bf16 %v1908_v33, %v1906_v27 }
 0x197   :  { %v3142_v6 = vpop.eup %3141  ;;  %v1643_v23 = vmul.f32 %v3140_v13, %v4044_v42  ;;  %3161 = vrcp.f32 %v1270_v17  ;;  %v2650_v46 = vmul.f32 -1.442695, %v4097_v51  ;;  %v4101_v49 = vpop.f32.mrb[37].mxu1  ;;  %2943 = vmatprep.subr.bf16.mxu0 %v2942_v34 }
 0x198   :  { %v3144_v58 = vpop.eup %3143  ;;  %v1271_v11 = vadd.f32 1.0, %v3142_v6  ;;  %3163 = vpow2.f32 %v2647_v10  ;;  %2043 = vmatmul.mubr.f32.gmra.mrb[20].mxu0 %v1638_v26  ;;  %v2651_v1 = vmul.f32 -1.442695, %v4101_v49  ;;  %v2956_v6 = vpack.c.bf16 %v1912_v29, %v1910_v24 }
 0x199   :  { %v3146_v53 = vpop.eup %3145  ;;  %v1274_v61 = vadd.f32 1.0, %v3144_v58  ;;  %3165 = vpow2.f32 %v2650_v46  ;;  %2048 = vmatprep.mubr.f32.mxu0 %v1643_v23  ;;  %v1916_v58 = vld [vmem:[#allocation7 + $0x3f0] sm:$0xff] }
 0x19a   :  { %v3148_v42 = vpop.eup %3147  ;;  %3167 = vrcp.f32 %v1271_v11  ;;  %v4105_v40 = vpop.f32.mrb[38].mxu1  ;;  %2945 = vmatpush1.bf16.msra.mxu0 %v2944_v47  ;;  %v1646_v0 = vmul.f32 %v3146_v53, %v4049_v30 }
 0x19b   :  { %v3150_v60 = vpop.eup %3149  ;;  %v1647_v32 = vmul.f32 %v3148_v42, %v4052_v21  ;;  %3169 = vrcp.f32 %v1274_v61  ;;  %v2654_v45 = vmul.f32 -1.442695, %v4105_v40  ;;  %v4109_v22 = vpop.f32.mrb[39].mxu1  ;;  %2947 = vmatprep.subr.bf16.mxu0 %v2946_v12 }
 0x19c   :  { %v3152_v44 = vpop.eup %3151  ;;  %v1275_v48 = vadd.f32 1.0, %v3150_v60  ;;  %3171 = vpow2.f32 %v2651_v1  ;;  %2049 = vmatmul.mubr.f32.gmra.mrb[22].mxu0 %v1642_v3  ;;  %v2655_v15 = vmul.f32 -1.442695, %v4109_v22 }
 0x19d   :  { %v3154_v43 = vpop.eup %3153  ;;  %3173 = vpow2.f32 %v2654_v45  ;;  %2054 = vmatprep.mubr.f32.mxu0 %v1647_v32  ;;  %v1650_v26 = vmul.f32 %v3152_v44, %v4057_v57 }
 0x19e   :  { %v3156_v21 = vpop.eup %3155  ;;  %3175 = vrcp.f32 %v1275_v48  ;;  %v1278_v52 = vadd.f32 1.0, %v3154_v43  ;;  %v4113_v4 = vpop.f32.mrb[40].mxu1  ;;  %2949 = vmatpush1.bf16.msra.mxu0 %v2948_v28 }
 0x19f   :  { %v3158_v39 = vpop.eup %3157  ;;  %v1279_v35 = vadd.f32 1.0, %v3156_v21  ;;  %3177 = vpow2.f32 %v2655_v15  ;;  %v2658_v63 = vmul.f32 -1.442695, %v4113_v4  ;;  %v4116_v34 = vpop.f32.mrb[41].mxu1  ;;  %2951 = vmatprep.subr.bf16.mxu0 %v2950_v19 }
 0x1a0   :  { %v3160_v50 = vpop.eup %3159  ;;  %3179 = vrcp.f32 %v1278_v52  ;;  %v1282_v30 = vadd.f32 1.0, %v3158_v39  ;;  %2055 = vmatmul.mubr.f32.gmra.mrb[24].mxu0 %v1646_v0  ;;  %v2659_v10 = vmul.f32 -1.442695, %v4116_v34 }
 0x1a1   :  { %v3162_v8 = vpop.eup %3161  ;;  %v1651_v17 = vmul.f32 %v3160_v50, %v4061_v38  ;;  %3181 = vrcp.f32 %v1279_v35  ;;  %v1914_v38 = vld [vmem:[#allocation7 + $0x3e0] sm:$0xff] }
 0x1a2   :  { %v3164_v13 = vpop.eup %3163  ;;  %3183 = vrcp.f32 %v1282_v30  ;;  %v4121_v47 = vpop.f32.mrb[42].mxu1  ;;  %2953 = vmatpush1.bf16.msra.mxu0 %v2952_v16  ;;  %v1654_v61 = vmul.f32 %v3162_v8, %v4065_v14  ;;  %v2960_v3 = vpack.c.bf16 %v1916_v58, %v1914_v38 }
 0x1a3   :  { %v3166_v23 = vpop.eup %3165  ;;  %v1283_v46 = vadd.f32 1.0, %v3164_v13  ;;  %3185 = vpow2.f32 %v2658_v63  ;;  %2060 = vmatprep.mubr.f32.mxu0 %v1651_v17  ;;  %v2662_v12 = vmul.f32 -1.442695, %v4121_v47  ;;  %v4124_v20 = vpop.f32.mrb[43].mxu1  ;;  %2955 = vmatprep.subr.bf16.mxu0 %v2954_v7 }
 0x1a4   :  { %v3168_v11 = vpop.eup %3167  ;;  %v1286_v1 = vadd.f32 1.0, %v3166_v23  ;;  %3187 = vpow2.f32 %v2659_v10  ;;  %2061 = vmatmul.mubr.f32.gmra.mrb[26].mxu0 %v1650_v26  ;;  %v2663_v57 = vmul.f32 -1.442695, %v4124_v20 }
 0x1a5   :  { %v3170_v18 = vpop.eup %3169  ;;  %v1655_v62 = vmul.f32 %v3168_v11, %v4068_v2  ;;  %3189 = vrcp.f32 %v1283_v46 }
 0x1a6   :  { %v3172_v53 = vpop.eup %3171  ;;  %3191 = vrcp.f32 %v1286_v1  ;;  %v4129_v42 = vpop.f32.mrb[44].mxu1  ;;  %2957 = vmatpush1.bf16.msra.mxu0 %v2956_v6  ;;  %v1658_v48 = vmul.f32 %v3170_v18, %v4073_v36 }
 0x1a7   :  { %v3174_v28 = vpop.eup %3173  ;;  %v1287_v60 = vadd.f32 1.0, %v3172_v53  ;;  %3193 = vpow2.f32 %v2662_v12  ;;  %2066 = vmatprep.mubr.f32.mxu0 %v1655_v62  ;;  %v2666_v32 = vmul.f32 -1.442695, %v4129_v42  ;;  %v4132_v45 = vpop.f32.mrb[45].mxu1  ;;  %2959 = vmatprep.subr.bf16.mxu0 %v2958_v5 }
 0x1a8   :  { %v3176_v19 = vpop.eup %3175  ;;  %v1290_v2 = vadd.f32 1.0, %v3174_v28  ;;  %3195 = vpow2.f32 %v2663_v57  ;;  %2067 = vmatmul.mubr.f32.gmra.mrb[28].mxu0 %v1654_v61  ;;  %v2667_v33 = vmul.f32 -1.442695, %v4132_v45 }
 0x1a9   :  { %v3178_v27 = vpop.eup %3177  ;;  %v1659_v14 = vmul.f32 %v3176_v19, %v4076_v31  ;;  %3197 = vrcp.f32 %v1287_v60 }
 0x1aa   :  { %v3180_v44 = vpop.eup %3179  ;;  %3199 = vrcp.f32 %v1290_v2  ;;  %v1291_v15 = vadd.f32 1.0, %v3178_v27  ;;  %v4137_v54 = vpop.f32.mrb[46].mxu1  ;;  %2961 = vmatpush1.bf16.msra.mxu0 %v2960_v3 }
 0x1ab   :  { %v3182_v56 = vpop.eup %3181  ;;  %3201 = vpow2.f32 %v2666_v32  ;;  %2072 = vmatprep.mubr.f32.mxu0 %v1659_v14  ;;  %v2670_v43 = vmul.f32 -1.442695, %v4137_v54  ;;  %v4140_v21 = vpop.f32.mrb[47].mxu1  ;;  %v1662_v39 = vmul.f32 %v3180_v44, %v4081_v9 }
 0x1ac   :  { %v3184_v0 = vpop.eup %3183  ;;  %v1663_v31 = vmul.f32 %v3182_v56, %v4084_v37  ;;  %3203 = vrcp.f32 %v1291_v15  ;;  %2073 = vmatmul.mubr.f32.gmra.mrb[30].mxu0 %v1658_v48  ;;  %v2671_v52 = vmul.f32 -1.442695, %v4140_v21 }
 0x1ad   :  { %v3186_v36 = vpop.eup %3185  ;;  %3205 = vpow2.f32 %v2667_v33  ;;  %v1666_v55 = vmul.f32 %v3184_v0, %v4089_v41 }
 0x1ae   :  { %v3188_v16 = vpop.eup %3187  ;;  %v1294_v35 = vadd.f32 1.0, %v3186_v36  ;;  %3207 = vpow2.f32 %v2670_v43  ;;  %2078 = vmatprep.mubr.f32.mxu0 %v1663_v31  ;;  %v4145_v63 = vpop.f32.mrb[48].mxu1 }
 0x1af   :  { %v3190_v7 = vpop.eup %3189  ;;  %v1295_v24 = vadd.f32 1.0, %v3188_v16  ;;  %3209 = vpow2.f32 %v2671_v52  ;;  %v2674_v29 = vmul.f32 -1.442695, %v4145_v63  ;;  %v4148_v37 = vpop.f32.mrb[49].mxu1 }
 0x1b0   :  { %v3192_v50 = vpop.eup %3191  ;;  %v1667_v30 = vmul.f32 %v3190_v7, %v4093_v25  ;;  %3211 = vrcp.f32 %v1294_v35  ;;  %2079 = vmatmul.mubr.f32.gmra.mrb[32].mxu0 %v1662_v39  ;;  %v2675_v10 = vmul.f32 -1.442695, %v4148_v37 }
 0x1b1   :  { %v3194_v9 = vpop.eup %3193  ;;  %3213 = vrcp.f32 %v1295_v24  ;;  %v1670_v38 = vmul.f32 %v3192_v50, %v4097_v51 }
 0x1b2   :  { %v3196_v59 = vpop.eup %3195  ;;  %v1298_v8 = vadd.f32 1.0, %v3194_v9  ;;  %3215 = vpow2.f32 %v2674_v29  ;;  %2084 = vmatprep.mubr.f32.mxu0 %v1667_v30  ;;  %v4153_v17 = vpop.f32.mrb[50].mxu1 }
 0x1b3   :  { %v3198_v13 = vpop.eup %3197  ;;  %v1299_v26 = vadd.f32 1.0, %v3196_v59  ;;  %3217 = vpow2.f32 %v2675_v10  ;;  %v2678_v6 = vmul.f32 -1.442695, %v4153_v17  ;;  %v4156_v25 = vpop.f32.mrb[51].mxu1 }
 0x1b4   :  { %v3200_v23 = vpop.eup %3199  ;;  %v1671_v46 = vmul.f32 %v3198_v13, %v4101_v49  ;;  %3219 = vrcp.f32 %v1298_v8  ;;  %2085 = vmatmul.mubr.f32.gmra.mrb[34].mxu0 %v1666_v55  ;;  %v2679_v12 = vmul.f32 -1.442695, %v4156_v25 }
 0x1b5   :  { %v3202_v41 = vpop.eup %3201  ;;  %3221 = vrcp.f32 %v1299_v26  ;;  %v1674_v60 = vmul.f32 %v3200_v23, %v4105_v40 }
 0x1b6   :  { %v3204_v5 = vpop.eup %3203  ;;  %v1302_v58 = vadd.f32 1.0, %v3202_v41  ;;  %3223 = vpow2.f32 %v2678_v6  ;;  %2090 = vmatprep.mubr.f32.mxu0 %v1671_v46  ;;  %v4161_v11 = vpop.f32.mrb[52].mxu1 }
 0x1b7   :  { %v3206_v1 = vpop.eup %3205  ;;  %v1675_v57 = vmul.f32 %v3204_v5, %v4109_v22  ;;  %3225 = vpow2.f32 %v2679_v12  ;;  %v2682_v49 = vmul.f32 -1.442695, %v4161_v11  ;;  %v4165_v18 = vpop.f32.mrb[53].mxu1 }
 0x1b8   :  { %v3208_v62 = vpop.eup %3207  ;;  %3227 = vrcp.f32 %v1302_v58  ;;  %v1303_v53 = vadd.f32 1.0, %v3206_v1  ;;  %2091 = vmatmul.mubr.f32.gmra.mrb[36].mxu0 %v1670_v38  ;;  %v2683_v51 = vmul.f32 -1.442695, %v4165_v18 }
 0x1b9   :  { %v3210_v61 = vpop.eup %3209  ;;  %v1306_v3 = vadd.f32 1.0, %v3208_v62  ;;  %3229 = vpow2.f32 %v2682_v49  ;;  %2096 = vmatprep.mubr.f32.mxu0 %v1675_v57 }
 0x1ba   :  { %v3212_v28 = vpop.eup %3211  ;;  %3231 = vrcp.f32 %v1303_v53  ;;  %v1307_v22 = vadd.f32 1.0, %v3210_v61  ;;  %v4169_v32 = vpop.f32.mrb[54].mxu1 }
 0x1bb   :  { %v3214_v19 = vpop.eup %3213  ;;  %3233 = vrcp.f32 %v1306_v3  ;;  %v2686_v2 = vmul.f32 -1.442695, %v4169_v32  ;;  %v4172_v27 = vpop.f32.mrb[55].mxu1  ;;  %v1678_v56 = vmul.f32 %v3212_v28, %v4113_v4 }
 0x1bc   :  { %v3216_v14 = vpop.eup %3215  ;;  %v1679_v33 = vmul.f32 %v3214_v19, %v4116_v34  ;;  %3235 = vrcp.f32 %v1307_v22  ;;  %2097 = vmatmul.mubr.f32.gmra.mrb[38].mxu0 %v1674_v60  ;;  %v2687_v40 = vmul.f32 -1.442695, %v4172_v27 }
 0x1bd   :  { %v3218_v44 = vpop.eup %3217  ;;  %v1310_v48 = vadd.f32 1.0, %v3216_v14  ;;  %3237 = vpow2.f32 %v2683_v51 }
 0x1be   :  { %v3220_v15 = vpop.eup %3219  ;;  %v1311_v43 = vadd.f32 1.0, %v3218_v44  ;;  %3239 = vpow2.f32 %v2686_v2  ;;  %2102 = vmatprep.mubr.f32.mxu0 %v1679_v33  ;;  %v4177_v0 = vpop.f32.mrb[56].mxu1 }
 0x1bf   :  { %v3222_v31 = vpop.eup %3221  ;;  %3241 = vrcp.f32 %v1310_v48  ;;  %v2690_v52 = vmul.f32 -1.442695, %v4177_v0  ;;  %v4180_v34 = vpop.f32.mrb[57].mxu1  ;;  %v1682_v24 = vmul.f32 %v3220_v15, %v4121_v47 }
 0x1c0   :  { %v3224_v36 = vpop.eup %3223  ;;  %v1683_v16 = vmul.f32 %v3222_v31, %v4124_v20  ;;  %3243 = vrcp.f32 %v1311_v43  ;;  %2103 = vmatmul.mubr.f32.gmra.mrb[40].mxu0 %v1678_v56  ;;  %v2691_v4 = vmul.f32 -1.442695, %v4180_v34 }
 0x1c1   :  { %v3226_v39 = vpop.eup %3225  ;;  %v1314_v35 = vadd.f32 1.0, %v3224_v36  ;;  %3245 = vpow2.f32 %v2687_v40 }
 0x1c2   :  { %v3228_v7 = vpop.eup %3227  ;;  %v1315_v29 = vadd.f32 1.0, %v3226_v39  ;;  %3247 = vpow2.f32 %v2690_v52  ;;  %2108 = vmatprep.mubr.f32.mxu0 %v1683_v16  ;;  %v4185_v50 = vpop.f32.mrb[58].mxu1 }
 0x1c3   :  { %v3230_v30 = vpop.eup %3229  ;;  %3249 = vrcp.f32 %v1314_v35  ;;  %v2694_v10 = vmul.f32 -1.442695, %v4185_v50  ;;  %v4188_v20 = vpop.f32.mrb[59].mxu1  ;;  %v1686_v26 = vmul.f32 %v3228_v7, %v4129_v42 }
 0x1c4   :  { %v3232_v9 = vpop.eup %3231  ;;  %3251 = vrcp.f32 %v1315_v29  ;;  %v1318_v59 = vadd.f32 1.0, %v3230_v30  ;;  %2109 = vmatmul.mubr.f32.gmra.mrb[42].mxu0 %v1682_v24  ;;  %v2695_v55 = vmul.f32 -1.442695, %v4188_v20 }
 0x1c5   :  { %v3234_v8 = vpop.eup %3233  ;;  %v1687_v47 = vmul.f32 %v3232_v9, %v4132_v45  ;;  %3253 = vpow2.f32 %v2691_v4 }
 0x1c6   :  { %v3236_v13 = vpop.eup %3235  ;;  %3255 = vrcp.f32 %v1318_v59  ;;  %v4193_v6 = vpop.f32.mrb[60].mxu1  ;;  %v1690_v57 = vmul.f32 %v3234_v8, %v4137_v54 }
 0x1c7   :  { %v3238_v23 = vpop.eup %3237  ;;  %v1691_v46 = vmul.f32 %v3236_v13, %v4140_v21  ;;  %3257 = vpow2.f32 %v2694_v10  ;;  %2114 = vmatprep.mubr.f32.mxu0 %v1687_v47  ;;  %v2698_v12 = vmul.f32 -1.442695, %v4193_v6  ;;  %v4197_v41 = vpop.f32.mrb[61].mxu1 }
 0x1c8   :  { %v3240_v5 = vpop.eup %3239  ;;  %v1319_v38 = vadd.f32 1.0, %v3238_v23  ;;  %3259 = vpow2.f32 %v2695_v55  ;;  %2115 = vmatmul.mubr.f32.gmra.mrb[44].mxu0 %v1686_v26  ;;  %v2699_v45 = vmul.f32 -1.442695, %v4197_v41 }
 0x1c9   :  { %v3242_v58 = vpop.eup %3241  ;;  %v1322_v42 = vadd.f32 1.0, %v3240_v5  ;;  %3261 = vpow2.f32 %v2698_v12  ;;  %2120 = vmatprep.mubr.f32.mxu0 %v1691_v46 }
 0x1ca   :  { %v3244_v1 = vpop.eup %3243  ;;  %3263 = vrcp.f32 %v1319_v38  ;;  %v4201_v21 = vpop.f32.mrb[62].mxu1  ;;  %v1694_v19 = vmul.f32 %v3242_v58, %v4145_v63 }
 0x1cb   :  { %v3246_v49 = vpop.eup %3245  ;;  %v1695_v62 = vmul.f32 %v3244_v1, %v4148_v37  ;;  %3265 = vrcp.f32 %v1322_v42  ;;  %v2702_v53 = vmul.f32 -1.442695, %v4201_v21  ;;  %v4205_v61 = vpop.f32.mrb[63].mxu1 }
 0x1cc   :  { %v3248_v3 = vpop.eup %3247  ;;  %v1323_v51 = vadd.f32 1.0, %v3246_v49  ;;  %3267 = vpow2.f32 %v2699_v45  ;;  %2121 = vmatmul.mubr.f32.gmra.mrb[46].mxu0 %v1690_v57  ;;  %v2703_v28 = vmul.f32 -1.442695, %v4205_v61 }
 0x1cd   :  { %v3250_v60 = vpop.eup %3249  ;;  %v1326_v22 = vadd.f32 1.0, %v3248_v3  ;;  %3269 = vpow2.f32 %v2702_v53  ;;  %2126 = vmatprep.mubr.f32.mxu0 %v1695_v62 }
 0x1ce   :  { %v3252_v54 = vpop.eup %3251  ;;  %3271 = vrcp.f32 %v1323_v51  ;;  %v4209_v37 = vpop.f32.mrb[64].mxu1  ;;  %v1698_v43 = vmul.f32 %v3250_v60, %v4153_v17 }
 0x1cf   :  { %v3254_v2 = vpop.eup %3253  ;;  %v1699_v14 = vmul.f32 %v3252_v54, %v4156_v25  ;;  %3273 = vrcp.f32 %v1326_v22  ;;  %v2580_v33 = vmul.f32 -1.442695, %v4209_v37  ;;  %v4213_v44 = vpop.f32.mrb[65].mxu1 }
 0x1d0   :  { %v3256_v48 = vpop.eup %3255  ;;  %v1327_v40 = vadd.f32 1.0, %v3254_v2  ;;  %3275 = vpow2.f32 %v2703_v28  ;;  %2127 = vmatmul.mubr.f32.gmra.mrb[48].mxu0 %v1694_v19  ;;  %v2581_v15 = vmul.f32 -1.442695, %v4213_v44 }
 0x1d1   :  { %v3258_v56 = vpop.eup %3257  ;;  %3277 = vpow2.f32 %v2580_v33  ;;  %2132 = vmatprep.mubr.f32.mxu0 %v1699_v14  ;;  %v1702_v30 = vmul.f32 %v3256_v48, %v4161_v11 }
 0x1d2   :  { %v3260_v63 = vpop.eup %3259  ;;  %3279 = vrcp.f32 %v1327_v40  ;;  %v1330_v31 = vadd.f32 1.0, %v3258_v56  ;;  %v4217_v25 = vpop.f32.mrb[66].mxu1 }
 0x1d3   :  { %v3262_v52 = vpop.eup %3261  ;;  %v1331_v36 = vadd.f32 1.0, %v3260_v63  ;;  %3281 = vpow2.f32 %v2581_v15  ;;  %v2584_v16 = vmul.f32 -1.442695, %v4217_v25  ;;  %v4220_v39 = vpop.f32.mrb[67].mxu1 }
 0x1d4   :  { %v3264_v35 = vpop.eup %3263  ;;  %3283 = vrcp.f32 %v1330_v31  ;;  %v1334_v4 = vadd.f32 1.0, %v3262_v52  ;;  %2133 = vmatmul.mubr.f32.gmra.mrb[50].mxu0 %v1698_v43  ;;  %v2585_v7 = vmul.f32 -1.442695, %v4220_v39 }
 0x1d5   :  { %v3266_v24 = vpop.eup %3265  ;;  %v1703_v17 = vmul.f32 %v3264_v35, %v4165_v18  ;;  %3285 = vrcp.f32 %v1331_v36 }
 0x1d6   :  { %v3268_v29 = vpop.eup %3267  ;;  %3287 = vrcp.f32 %v1334_v4  ;;  %v4225_v10 = vpop.f32.mrb[68].mxu1  ;;  %v1706_v46 = vmul.f32 %v3266_v24, %v4169_v32 }
 0x1d7   :  { %v3270_v9 = vpop.eup %3269  ;;  %v1335_v59 = vadd.f32 1.0, %v3268_v29  ;;  %3289 = vpow2.f32 %v2584_v16  ;;  %2138 = vmatprep.mubr.f32.mxu0 %v1703_v17  ;;  %v2588_v55 = vmul.f32 -1.442695, %v4225_v10  ;;  %v4228_v8 = vpop.f32.mrb[69].mxu1 }
 0x1d8   :  { %v3272_v47 = vpop.eup %3271  ;;  %v1338_v13 = vadd.f32 1.0, %v3270_v9  ;;  %3291 = vpow2.f32 %v2585_v7  ;;  %2139 = vmatmul.mubr.f32.gmra.mrb[52].mxu0 %v1702_v30  ;;  %v2589_v18 = vmul.f32 -1.442695, %v4228_v8 }
 0x1d9   :  { %v3274_v26 = vpop.eup %3273  ;;  %v1707_v11 = vmul.f32 %v3272_v47, %v4172_v27  ;;  %3293 = vrcp.f32 %v1335_v59 }
 0x1da   :  { %v3276_v23 = vpop.eup %3275  ;;  %3295 = vrcp.f32 %v1338_v13  ;;  %v4233_v12 = vpop.f32.mrb[70].mxu1  ;;  %v1710_v62 = vmul.f32 %v3274_v26, %v4177_v0 }
 0x1db   :  { %v3278_v5 = vpop.eup %3277  ;;  %v1339_v38 = vadd.f32 1.0, %v3276_v23  ;;  %3297 = vpow2.f32 %v2588_v55  ;;  %2144 = vmatprep.mubr.f32.mxu0 %v1707_v11  ;;  %v2592_v45 = vmul.f32 -1.442695, %v4233_v12  ;;  %v4236_v58 = vpop.f32.mrb[71].mxu1 }
 0x1dc   :  { %v3280_v42 = vpop.eup %3279  ;;  %v1216_v1 = vadd.f32 1.0, %v3278_v5  ;;  %3299 = vpow2.f32 %v2589_v18  ;;  %2145 = vmatmul.mubr.f32.gmra.mrb[54].mxu0 %v1706_v46  ;;  %v2593_v32 = vmul.f32 -1.442695, %v4236_v58 }
 0x1dd   :  { %v3282_v27 = vpop.eup %3281  ;;  %v1711_v57 = vmul.f32 %v3280_v42, %v4180_v34  ;;  %3301 = vrcp.f32 %v1339_v38 }
 0x1de   :  { %v3284_v49 = vpop.eup %3283  ;;  %3303 = vrcp.f32 %v1216_v1  ;;  %v1217_v53 = vadd.f32 1.0, %v3282_v27  ;;  %v4241_v3 = vpop.f32.mrb[72].mxu1 }
 0x1df   :  { %v3286_v51 = vpop.eup %3285  ;;  %3305 = vpow2.f32 %v2592_v45  ;;  %2150 = vmatprep.mubr.f32.mxu0 %v1711_v57  ;;  %v2596_v28 = vmul.f32 -1.442695, %v4241_v3  ;;  %v4244_v60 = vpop.f32.mrb[73].mxu1  ;;  %v1714_v2 = vmul.f32 %v3284_v49, %v4185_v50 }
 0x1e0   :  { %v3288_v22 = vpop.eup %3287  ;;  %v1715_v34 = vmul.f32 %v3286_v51, %v4188_v20  ;;  %3307 = vrcp.f32 %v1217_v53  ;;  %2151 = vmatmul.mubr.f32.gmra.mrb[56].mxu0 %v1710_v62  ;;  %v2597_v54 = vmul.f32 -1.442695, %v4244_v60 }
 0x1e1   :  { %v3290_v19 = vpop.eup %3289  ;;  %3309 = vpow2.f32 %v2593_v32  ;;  %v1718_v52 = vmul.f32 %v3288_v22, %v4193_v6 }
 0x1e2   :  { %v3292_v0 = vpop.eup %3291  ;;  %v1220_v14 = vadd.f32 1.0, %v3290_v19  ;;  %3311 = vpow2.f32 %v2596_v28  ;;  %2156 = vmatprep.mubr.f32.mxu0 %v1715_v34  ;;  %v4249_v33 = vpop.f32.mrb[74].mxu1 }
 0x1e3   :  { %v3294_v48 = vpop.eup %3293  ;;  %v1221_v40 = vadd.f32 1.0, %v3292_v0  ;;  %3313 = vpow2.f32 %v2597_v54  ;;  %v2600_v15 = vmul.f32 -1.442695, %v4249_v33  ;;  %v4252_v20 = vpop.f32.mrb[75].mxu1 }
 0x1e4   :  { %v3296_v56 = vpop.eup %3295  ;;  %v1719_v63 = vmul.f32 %v3294_v48, %v4197_v41  ;;  %3315 = vrcp.f32 %v1220_v14  ;;  %2157 = vmatmul.mubr.f32.gmra.mrb[58].mxu0 %v1714_v2  ;;  %v2601_v43 = vmul.f32 -1.442695, %v4252_v20 }
 0x1e5   :  { %v3298_v50 = vpop.eup %3297  ;;  %3317 = vrcp.f32 %v1221_v40  ;;  %v1722_v9 = vmul.f32 %v3296_v56, %v4201_v21 }
 0x1e6   :  { %v3300_v31 = vpop.eup %3299  ;;  %v1224_v36 = vadd.f32 1.0, %v3298_v50  ;;  %3319 = vpow2.f32 %v2600_v15  ;;  %2162 = vmatprep.mubr.f32.mxu0 %v1719_v63  ;;  %v4257_v16 = vpop.f32.mrb[76].mxu1 }
 0x1e7   :  { %v3302_v35 = vpop.eup %3301  ;;  %v1225_v4 = vadd.f32 1.0, %v3300_v31  ;;  %3321 = vpow2.f32 %v2601_v43  ;;  %v2604_v7 = vmul.f32 -1.442695, %v4257_v16  ;;  %v4260_v41 = vpop.f32.mrb[77].mxu1 }
 0x1e8   :  { %v3304_v24 = vpop.eup %3303  ;;  %v1723_v17 = vmul.f32 %v3302_v35, %v4205_v61  ;;  %3323 = vrcp.f32 %v1224_v36  ;;  %2163 = vmatmul.mubr.f32.gmra.mrb[60].mxu0 %v1718_v52  ;;  %v2605_v29 = vmul.f32 -1.442695, %v4260_v41 }
 0x1e9   :  { %v3306_v6 = vpop.eup %3305  ;;  %3325 = vrcp.f32 %v1225_v4  ;;  %v1600_v38 = vmul.f32 %v3304_v24, %v4209_v37 }
 0x1ea   :  { %v3308_v30 = vpop.eup %3307  ;;  %v1228_v59 = vadd.f32 1.0, %v3306_v6  ;;  %3327 = vpow2.f32 %v2604_v7  ;;  %2168 = vmatprep.mubr.f32.mxu0 %v1723_v17  ;;  %v4265_v55 = vpop.f32.mrb[78].mxu1 }
 0x1eb   :  { %v3310_v47 = vpop.eup %3309  ;;  %v1601_v13 = vmul.f32 %v3308_v30, %v4213_v44  ;;  %3329 = vpow2.f32 %v2605_v29  ;;  %v2608_v61 = vmul.f32 -1.442695, %v4265_v55  ;;  %v4269_v18 = vpop.f32.mrb[79].mxu1 }
 0x1ec   :  { %v3312_v26 = vpop.eup %3311  ;;  %3331 = vrcp.f32 %v1228_v59  ;;  %v1229_v11 = vadd.f32 1.0, %v3310_v47  ;;  %2169 = vmatmul.mubr.f32.gmra.mrb[62].mxu0 %v1722_v9  ;;  %v2609_v21 = vmul.f32 -1.442695, %v4269_v18 }
 0x1ed   :  { %v3314_v23 = vpop.eup %3313  ;;  %v1232_v46 = vadd.f32 1.0, %v3312_v26  ;;  %3333 = vpow2.f32 %v2608_v61  ;;  %2239 = vmatprep.mubr.f32.mxu0 %v1601_v13 }
 0x1ee   :  { %v3316_v5 = vpop.eup %3315  ;;  %3335 = vrcp.f32 %v1229_v11  ;;  %v1233_v44 = vadd.f32 1.0, %v3314_v23  ;;  %v4273_v45 = vpop.f32.mrb[80].mxu1 }
 0x1ef   :  { %v3318_v42 = vpop.eup %3317  ;;  %3337 = vrcp.f32 %v1232_v46  ;;  %v2612_v1 = vmul.f32 -1.442695, %v4273_v45  ;;  %v4276_v27 = vpop.f32.mrb[81].mxu1  ;;  %v1604_v51 = vmul.f32 %v3316_v5, %v4217_v25 }
 0x1f0   :  { %v3320_v57 = vpop.eup %3319  ;;  %v1605_v32 = vmul.f32 %v3318_v42, %v4220_v39  ;;  %3339 = vrcp.f32 %v1233_v44  ;;  %2240 = vmatmul.mubr.f32.vlgmr.msra.gmra.mrb[0].mxu0 %v1600_v38  ;;  %v2613_v37 = vmul.f32 -1.442695, %v4276_v27 }
 0x1f1   :  { %v3322_v49 = vpop.eup %3321  ;;  %v1236_v62 = vadd.f32 1.0, %v3320_v57  ;;  %3341 = vpow2.f32 %v2609_v21 }
 0x1f2   :  { %v3324_v53 = vpop.eup %3323  ;;  %v1237_v28 = vadd.f32 1.0, %v3322_v49  ;;  %3343 = vpow2.f32 %v2612_v1  ;;  %2245 = vmatprep.mubr.f32.mxu0 %v1605_v32  ;;  %v4281_v22 = vpop.f32.mrb[82].mxu1 }
 0x1f3   :  { %v3326_v34 = vpop.eup %3325  ;;  %3345 = vrcp.f32 %v1236_v62  ;;  %v2616_v54 = vmul.f32 -1.442695, %v4281_v22  ;;  %v4284_v39 = vpop.f32.mrb[83].mxu1  ;;  %v1608_v40 = vmul.f32 %v3324_v53, %v4225_v10 }
 0x1f4   :  { %v3328_v19 = vpop.eup %3327  ;;  %v1609_v0 = vmul.f32 %v3326_v34, %v4228_v8  ;;  %3347 = vrcp.f32 %v1237_v28  ;;  %2246 = vmatmul.mubr.f32.gmra.mrb[2].mxu0 %v1604_v51  ;;  %v2617_v25 = vmul.f32 -1.442695, %v4284_v39 }
 0x1f5   :  { %v3330_v2 = vpop.eup %3329  ;;  %v1240_v14 = vadd.f32 1.0, %v3328_v19  ;;  %3349 = vpow2.f32 %v2613_v37 }
 0x1f6   :  { %v3332_v48 = vpop.eup %3331  ;;  %v1241_v15 = vadd.f32 1.0, %v3330_v2  ;;  %3351 = vpow2.f32 %v2616_v54  ;;  %2251 = vmatprep.mubr.f32.mxu0 %v1609_v0  ;;  %v4289_v56 = vpop.f32.mrb[84].mxu1 }
 0x1f7   :  { %v3334_v63 = vpop.eup %3333  ;;  %3353 = vrcp.f32 %v1240_v14  ;;  %v2620_v43 = vmul.f32 -1.442695, %v4289_v56  ;;  %v4292_v8 = vpop.f32.mrb[85].mxu1  ;;  %v1612_v4 = vmul.f32 %v3332_v48, %v4233_v12 }
 0x1f8   :  { %v3336_v50 = vpop.eup %3335  ;;  %3355 = vrcp.f32 %v1241_v15  ;;  %v1244_v31 = vadd.f32 1.0, %v3334_v63  ;;  %2252 = vmatmul.mubr.f32.gmra.mrb[4].mxu0 %v1608_v40  ;;  %v2621_v52 = vmul.f32 -1.442695, %v4292_v8 }
 0x1f9   :  { %v3338_v36 = vpop.eup %3337  ;;  %v1613_v10 = vmul.f32 %v3336_v50, %v4236_v58  ;;  %3357 = vpow2.f32 %v2617_v25 }
 0x1fa   :  { %v3340_v35 = vpop.eup %3339  ;;  %3359 = vrcp.f32 %v1244_v31  ;;  %v4297_v7 = vpop.f32.mrb[86].mxu1  ;;  %v1616_v13 = vmul.f32 %v3338_v36, %v4241_v3 }
 0x1fb   :  { %v3342_v24 = vpop.eup %3341  ;;  %v1617_v17 = vmul.f32 %v3340_v35, %v4244_v60  ;;  %3361 = vpow2.f32 %v2620_v43  ;;  %2257 = vmatprep.mubr.f32.mxu0 %v1613_v10  ;;  %v2624_v29 = vmul.f32 -1.442695, %v4297_v7  ;;  %v4301_v6 = vpop.f32.mrb[87].mxu1 }
 0x1fc   :  { %v3344_v30 = vpop.eup %3343  ;;  %v1245_v9 = vadd.f32 1.0, %v3342_v24  ;;  %3363 = vpow2.f32 %v2621_v52  ;;  %2258 = vmatmul.mubr.f32.gmra.mrb[6].mxu0 %v1612_v4  ;;  %v2625_v58 = vmul.f32 -1.442695, %v4301_v6 }
 0x1fd   :  { %v3346_v59 = vpop.eup %3345  ;;  %v1248_v12 = vadd.f32 1.0, %v3344_v30  ;;  %3365 = vpow2.f32 %v2624_v29  ;;  %2263 = vmatprep.mubr.f32.mxu0 %v1617_v17 }
 0x1fe   :  { %v3348_v47 = vpop.eup %3347  ;;  %3367 = vrcp.f32 %v1245_v9  ;;  %v4305_v60 = vpop.f32.mrb[88].mxu1  ;;  %v1620_v42 = vmul.f32 %v3346_v59, %v4249_v33 }
 0x1ff   :  { %v3350_v61 = vpop.eup %3349  ;;  %v1621_v26 = vmul.f32 %v3348_v47, %v4252_v20  ;;  %3369 = vrcp.f32 %v1248_v12  ;;  %v2628_v11 = vmul.f32 -1.442695, %v4305_v60  ;;  %v4309_v23 = vpop.f32.mrb[89].mxu1 }
 0x200   :  { %v3352_v46 = vpop.eup %3351  ;;  %v1249_v21 = vadd.f32 1.0, %v3350_v61  ;;  %3371 = vpow2.f32 %v2625_v58  ;;  %2264 = vmatmul.mubr.f32.gmra.mrb[8].mxu0 %v1616_v13  ;;  %v2629_v5 = vmul.f32 -1.442695, %v4309_v23 }
 0x201   :  { %v3354_v38 = vpop.eup %3353  ;;  %v1252_v44 = vadd.f32 1.0, %v3352_v46  ;;  %3373 = vpow2.f32 %v2628_v11  ;;  %2269 = vmatprep.mubr.f32.mxu0 %v1621_v26 }
 0x202   :  { %v3356_v3 = vpop.eup %3355  ;;  %3375 = vrcp.f32 %v1249_v21  ;;  %v4313_v20 = vpop.f32.mrb[90].mxu1  ;;  %v1624_v28 = vmul.f32 %v3354_v38, %v4257_v16 }
 0x203   :  { %v3358_v1 = vpop.eup %3357  ;;  %v1625_v57 = vmul.f32 %v3356_v3, %v4260_v41  ;;  %3377 = vrcp.f32 %v1252_v44  ;;  %v2632_v32 = vmul.f32 -1.442695, %v4313_v20  ;;  %v4317_v49 = vpop.f32.mrb[91].mxu1 }
 0x204   :  { %v3360_v62 = vpop.eup %3359  ;;  %v1253_v37 = vadd.f32 1.0, %v3358_v1  ;;  %3379 = vpow2.f32 %v2629_v5  ;;  %2270 = vmatmul.mubr.f32.gmra.mrb[10].mxu0 %v1620_v42  ;;  %v2633_v53 = vmul.f32 -1.442695, %v4317_v49 }
 0x205   :  { %v3362_v51 = vpop.eup %3361  ;;  %3381 = vpow2.f32 %v2632_v32  ;;  %2275 = vmatprep.mubr.f32.mxu0 %v1625_v57  ;;  %v1628_v63 = vmul.f32 %v3360_v62, %v4265_v55 }
 0x206   :  { %v3364_v33 = vpop.eup %3363  ;;  %3383 = vrcp.f32 %v1253_v37  ;;  %v1256_v34 = vadd.f32 1.0, %v3362_v51  ;;  %v4321_v41 = vpop.f32.mrb[92].mxu1 }
 0x207   :  { %v3366_v54 = vpop.eup %3365  ;;  %v1257_v19 = vadd.f32 1.0, %v3364_v33  ;;  %3385 = vpow2.f32 %v2633_v53  ;;  %v2636_v0 = vmul.f32 -1.442695, %v4321_v41  ;;  %v4324_v2 = vpop.f32.mrb[93].mxu1 }
 0x208   :  { %v3368_v14 = vpop.eup %3367  ;;  %3387 = vrcp.f32 %v1256_v34  ;;  %v1260_v25 = vadd.f32 1.0, %v3366_v54  ;;  %2276 = vmatmul.mubr.f32.gmra.mrb[12].mxu0 %v1624_v28  ;;  %v2637_v48 = vmul.f32 -1.442695, %v4324_v2 }
 0x209   :  { %v3370_v40 = vpop.eup %3369  ;;  %v1629_v16 = vmul.f32 %v3368_v14, %v4269_v18  ;;  %3389 = vrcp.f32 %v1257_v19 }
 0x20a   :  { %v3372_v15 = vpop.eup %3371  ;;  %3391 = vrcp.f32 %v1260_v25  ;;  %v4329_v43 = vpop.f32.mrb[94].mxu1  ;;  %v1632_v17 = vmul.f32 %v3370_v40, %v4273_v45 }
 0x20b   :  { %v3374_v50 = vpop.eup %3373  ;;  %v1261_v31 = vadd.f32 1.0, %v3372_v15  ;;  %3393 = vpow2.f32 %v2636_v0  ;;  %2281 = vmatprep.mubr.f32.mxu0 %v1629_v16  ;;  %v2640_v52 = vmul.f32 -1.442695, %v4329_v43  ;;  %v4332_v36 = vpop.f32.mrb[95].mxu1 }
 0x20c   :  { %v3376_v10 = vpop.eup %3375  ;;  %v1264_v35 = vadd.f32 1.0, %v3374_v50  ;;  %3395 = vpow2.f32 %v2637_v48  ;;  %2282 = vmatmul.mubr.f32.gmra.mrb[14].mxu0 %v1628_v63  ;;  %v2641_v18 = vmul.f32 -1.442695, %v4332_v36 }
 0x20d   :  { %v3378_v4 = vpop.eup %3377  ;;  %v1633_v55 = vmul.f32 %v3376_v10, %v4276_v27  ;;  %3397 = vrcp.f32 %v1261_v31 }
 0x20e   :  { %v3380_v24 = vpop.eup %3379  ;;  %3399 = vrcp.f32 %v1264_v35  ;;  %v4337_v29 = vpop.f32.mrb[96].mxu1  ;;  %v1636_v26 = vmul.f32 %v3378_v4, %v4281_v22 }
 0x20f   :  { %v3382_v30 = vpop.eup %3381  ;;  %v1265_v9 = vadd.f32 1.0, %v3380_v24  ;;  %3401 = vpow2.f32 %v2640_v52  ;;  %2287 = vmatprep.mubr.f32.mxu0 %v1633_v55  ;;  %v2644_v58 = vmul.f32 -1.442695, %v4337_v29  ;;  %v4340_v59 = vpop.f32.mrb[97].mxu1 }
 0x210   :  { %v3384_v12 = vpop.eup %3383  ;;  %v1268_v47 = vadd.f32 1.0, %v3382_v30  ;;  %3403 = vpow2.f32 %v2641_v18  ;;  %2288 = vmatmul.mubr.f32.gmra.mrb[16].mxu0 %v1632_v17  ;;  %v2645_v45 = vmul.f32 -1.442695, %v4340_v59 }
 0x211   :  { %v3386_v27 = vpop.eup %3385  ;;  %v1637_v13 = vmul.f32 %v3384_v12, %v4284_v39  ;;  %3405 = vrcp.f32 %v1265_v9 }
 0x212   :  { %v3388_v61 = vpop.eup %3387  ;;  %3407 = vrcp.f32 %v1268_v47  ;;  %v1269_v11 = vadd.f32 1.0, %v3386_v27  ;;  %v4345_v46 = vpop.f32.mrb[98].mxu1 }
 0x213   :  { %v3390_v21 = vpop.eup %3389  ;;  %3409 = vpow2.f32 %v2644_v58  ;;  %2293 = vmatprep.mubr.f32.mxu0 %v1637_v13  ;;  %v2648_v5 = vmul.f32 -1.442695, %v4345_v46  ;;  %v4348_v38 = vpop.f32.mrb[99].mxu1  ;;  %v1640_v1 = vmul.f32 %v3388_v61, %v4289_v56 }
 0x214   :  { %v3392_v44 = vpop.eup %3391  ;;  %v1641_v39 = vmul.f32 %v3390_v21, %v4292_v8  ;;  %3411 = vrcp.f32 %v1269_v11  ;;  %2294 = vmatmul.mubr.f32.gmra.mrb[18].mxu0 %v1636_v26  ;;  %v2649_v3 = vmul.f32 -1.442695, %v4348_v38 }
 0x215   :  { %v3394_v42 = vpop.eup %3393  ;;  %3413 = vpow2.f32 %v2645_v45  ;;  %v1644_v54 = vmul.f32 %v3392_v44, %v4297_v7 }
 0x216   :  { %v3396_v22 = vpop.eup %3395  ;;  %v1272_v57 = vadd.f32 1.0, %v3394_v42  ;;  %3415 = vpow2.f32 %v2648_v5  ;;  %2299 = vmatprep.mubr.f32.mxu0 %v1641_v39  ;;  %v4353_v32 = vpop.f32.mrb[100].mxu1 }
 0x217   :  { %v3398_v62 = vpop.eup %3397  ;;  %v1273_v37 = vadd.f32 1.0, %v3396_v22  ;;  %3417 = vpow2.f32 %v2649_v3  ;;  %v2652_v53 = vmul.f32 -1.442695, %v4353_v32  ;;  %v4356_v8 = vpop.f32.mrb[101].mxu1 }
 0x218   :  { %v3400_v51 = vpop.eup %3399  ;;  %v1645_v33 = vmul.f32 %v3398_v62, %v4301_v6  ;;  %3419 = vrcp.f32 %v1272_v57  ;;  %2300 = vmatmul.mubr.f32.gmra.mrb[20].mxu0 %v1640_v1  ;;  %v2653_v28 = vmul.f32 -1.442695, %v4356_v8 }
 0x219   :  { %v3402_v56 = vpop.eup %3401  ;;  %3421 = vrcp.f32 %v1273_v37  ;;  %v1648_v50 = vmul.f32 %v3400_v51, %v4305_v60 }
 0x21a   :  { %v3404_v34 = vpop.eup %3403  ;;  %v1276_v19 = vadd.f32 1.0, %v3402_v56  ;;  %3423 = vpow2.f32 %v2652_v53  ;;  %2305 = vmatprep.mubr.f32.mxu0 %v1645_v33  ;;  %v4361_v0 = vpop.f32.mrb[102].mxu1 }
 0x21b   :  { %v3406_v14 = vpop.eup %3405  ;;  %v1277_v25 = vadd.f32 1.0, %v3404_v34  ;;  %3425 = vpow2.f32 %v2653_v28  ;;  %v2656_v48 = vmul.f32 -1.442695, %v4361_v0  ;;  %v4364_v6 = vpop.f32.mrb[103].mxu1 }
 0x21c   :  { %v3408_v40 = vpop.eup %3407  ;;  %v1649_v16 = vmul.f32 %v3406_v14, %v4309_v23  ;;  %3427 = vrcp.f32 %v1276_v19  ;;  %2306 = vmatmul.mubr.f32.gmra.mrb[22].mxu0 %v1644_v54  ;;  %v2657_v15 = vmul.f32 -1.442695, %v4364_v6 }
 0x21d   :  { %v3410_v7 = vpop.eup %3409  ;;  %3429 = vrcp.f32 %v1277_v25  ;;  %v1652_v9 = vmul.f32 %v3408_v40, %v4313_v20 }
 0x21e   :  { %v3412_v63 = vpop.eup %3411  ;;  %v1280_v31 = vadd.f32 1.0, %v3410_v7  ;;  %3431 = vpow2.f32 %v2656_v48  ;;  %2311 = vmatprep.mubr.f32.mxu0 %v1649_v16  ;;  %v4369_v52 = vpop.f32.mrb[104].mxu1 }
 0x21f   :  { %v3414_v10 = vpop.eup %3413  ;;  %v1653_v35 = vmul.f32 %v3412_v63, %v4317_v49  ;;  %3433 = vpow2.f32 %v2657_v15  ;;  %v2660_v23 = vmul.f32 -1.442695, %v4369_v52  ;;  %v4373_v18 = vpop.f32.mrb[105].mxu1 }
 0x220   :  { %v3416_v4 = vpop.eup %3415  ;;  %3435 = vrcp.f32 %v1280_v31  ;;  %v1281_v55 = vadd.f32 1.0, %v3414_v10  ;;  %2312 = vmatmul.mubr.f32.gmra.mrb[24].mxu0 %v1648_v50  ;;  %v2661_v60 = vmul.f32 -1.442695, %v4373_v18 }
 0x221   :  { %v3418_v24 = vpop.eup %3417  ;;  %v1284_v17 = vadd.f32 1.0, %v3416_v4  ;;  %3437 = vpow2.f32 %v2660_v23  ;;  %2317 = vmatprep.mubr.f32.mxu0 %v1653_v35 }
 0x222   :  { %v3420_v30 = vpop.eup %3419  ;;  %3439 = vrcp.f32 %v1281_v55  ;;  %v1285_v49 = vadd.f32 1.0, %v3418_v24  ;;  %v4377_v58 = vpop.f32.mrb[106].mxu1 }
 0x223   :  { %v3422_v12 = vpop.eup %3421  ;;  %3441 = vrcp.f32 %v1284_v17  ;;  %v2664_v47 = vmul.f32 -1.442695, %v4377_v58  ;;  %v4380_v27 = vpop.f32.mrb[107].mxu1  ;;  %v1656_v21 = vmul.f32 %v3420_v30, %v4321_v41 }
 0x224   :  { %v3424_v13 = vpop.eup %3423  ;;  %v1657_v45 = vmul.f32 %v3422_v12, %v4324_v2  ;;  %3443 = vrcp.f32 %v1285_v49  ;;  %2318 = vmatmul.mubr.f32.gmra.mrb[26].mxu0 %v1652_v9  ;;  %v2665_v20 = vmul.f32 -1.442695, %v4380_v27 }
 0x225   :  { %v3426_v61 = vpop.eup %3425  ;;  %v1288_v26 = vadd.f32 1.0, %v3424_v13  ;;  %3445 = vpow2.f32 %v2661_v60 }
 0x226   :  { %v3428_v11 = vpop.eup %3427  ;;  %v1289_v5 = vadd.f32 1.0, %v3426_v61  ;;  %3447 = vpow2.f32 %v2664_v47  ;;  %2323 = vmatprep.mubr.f32.mxu0 %v1657_v45  ;;  %v4385_v44 = vpop.f32.mrb[108].mxu1 }
 0x227   :  { %v3430_v39 = vpop.eup %3429  ;;  %3449 = vrcp.f32 %v1288_v26  ;;  %v2668_v3 = vmul.f32 -1.442695, %v4385_v44  ;;  %v4388_v2 = vpop.f32.mrb[109].mxu1  ;;  %v1660_v37 = vmul.f32 %v3428_v11, %v4329_v43 }
 0x228   :  { %v3432_v42 = vpop.eup %3431  ;;  %v1661_v22 = vmul.f32 %v3430_v39, %v4332_v36  ;;  %3451 = vrcp.f32 %v1289_v5  ;;  %2324 = vmatmul.mubr.f32.gmra.mrb[28].mxu0 %v1656_v21  ;;  %v2669_v41 = vmul.f32 -1.442695, %v4388_v2 }
 0x229   :  { %v3434_v1 = vpop.eup %3433  ;;  %v1292_v57 = vadd.f32 1.0, %v3432_v42  ;;  %3453 = vpow2.f32 %v2665_v20 }
 0x22a   :  { %v3436_v62 = vpop.eup %3435  ;;  %v1293_v53 = vadd.f32 1.0, %v3434_v1  ;;  %3455 = vpow2.f32 %v2668_v3  ;;  %2329 = vmatprep.mubr.f32.mxu0 %v1661_v22  ;;  %v4393_v51 = vpop.f32.mrb[110].mxu1 }
 0x22b   :  { %v3438_v33 = vpop.eup %3437  ;;  %3457 = vrcp.f32 %v1292_v57  ;;  %v2672_v28 = vmul.f32 -1.442695, %v4393_v51  ;;  %v4396_v36 = vpop.f32.mrb[111].mxu1  ;;  %v1664_v25 = vmul.f32 %v3436_v62, %v4337_v29 }
 0x22c   :  { %v3440_v56 = vpop.eup %3439  ;;  %3459 = vrcp.f32 %v1293_v53  ;;  %v1296_v34 = vadd.f32 1.0, %v3438_v33  ;;  %2330 = vmatmul.mubr.f32.gmra.mrb[30].mxu0 %v1660_v37  ;;  %v2673_v54 = vmul.f32 -1.442695, %v4396_v36 }
 0x22d   :  { %v3442_v19 = vpop.eup %3441  ;;  %v1665_v43 = vmul.f32 %v3440_v56, %v4340_v59  ;;  %3461 = vpow2.f32 %v2669_v41 }
 0x22e   :  { %v3444_v14 = vpop.eup %3443  ;;  %3463 = vrcp.f32 %v1296_v34  ;;  %v4401_v48 = vpop.f32.mrb[112].mxu1  ;;  %v1668_v35 = vmul.f32 %v3442_v19, %v4345_v46 }
 0x22f   :  { %v3446_v40 = vpop.eup %3445  ;;  %v1669_v16 = vmul.f32 %v3444_v14, %v4348_v38  ;;  %3465 = vpow2.f32 %v2672_v28  ;;  %2335 = vmatprep.mubr.f32.mxu0 %v1665_v43  ;;  %v2676_v15 = vmul.f32 -1.442695, %v4401_v48  ;;  %v4405_v7 = vpop.f32.mrb[113].mxu1 }
 0x230   :  { %v3448_v63 = vpop.eup %3447  ;;  %v1297_v50 = vadd.f32 1.0, %v3446_v40  ;;  %3467 = vpow2.f32 %v2673_v54  ;;  %2336 = vmatmul.mubr.f32.gmra.mrb[32].mxu0 %v1664_v25  ;;  %v2677_v59 = vmul.f32 -1.442695, %v4405_v7 }
 0x231   :  { %v3450_v31 = vpop.eup %3449  ;;  %v1300_v29 = vadd.f32 1.0, %v3448_v63  ;;  %3469 = vpow2.f32 %v2676_v15  ;;  %2341 = vmatprep.mubr.f32.mxu0 %v1669_v16 }
 0x232   :  { %v3452_v10 = vpop.eup %3451  ;;  %3471 = vrcp.f32 %v1297_v50  ;;  %v4409_v38 = vpop.f32.mrb[114].mxu1  ;;  %v1672_v12 = vmul.f32 %v3450_v31, %v4353_v32 }
 0x233   :  { %v3454_v23 = vpop.eup %3453  ;;  %v1673_v4 = vmul.f32 %v3452_v10, %v4356_v8  ;;  %3473 = vrcp.f32 %v1300_v29  ;;  %v2680_v55 = vmul.f32 -1.442695, %v4409_v38  ;;  %v4413_v24 = vpop.f32.mrb[115].mxu1 }
 0x234   :  { %v3456_v17 = vpop.eup %3455  ;;  %v1301_v60 = vadd.f32 1.0, %v3454_v23  ;;  %3475 = vpow2.f32 %v2677_v59  ;;  %2342 = vmatmul.mubr.f32.gmra.mrb[34].mxu0 %v1668_v35  ;;  %v2681_v30 = vmul.f32 -1.442695, %v4413_v24 }
 0x235   :  { %v3458_v9 = vpop.eup %3457  ;;  %v1304_v49 = vadd.f32 1.0, %v3456_v17  ;;  %3477 = vpow2.f32 %v2680_v55  ;;  %2347 = vmatprep.mubr.f32.mxu0 %v1673_v4 }
 0x236   :  { %v3460_v46 = vpop.eup %3459  ;;  %3479 = vrcp.f32 %v1301_v60  ;;  %v4417_v8 = vpop.f32.mrb[116].mxu1  ;;  %v1676_v5 = vmul.f32 %v3458_v9, %v4361_v0 }
 0x237   :  { %v3462_v47 = vpop.eup %3461  ;;  %v1677_v13 = vmul.f32 %v3460_v46, %v4364_v6  ;;  %3481 = vrcp.f32 %v1304_v49  ;;  %v2684_v45 = vmul.f32 -1.442695, %v4417_v8  ;;  %v4421_v61 = vpop.f32.mrb[117].mxu1 }
 0x238   :  { %v3464_v26 = vpop.eup %3463  ;;  %v1305_v20 = vadd.f32 1.0, %v3462_v47  ;;  %3483 = vpow2.f32 %v2681_v30  ;;  %2348 = vmatmul.mubr.f32.gmra.mrb[36].mxu0 %v1672_v12  ;;  %v2685_v11 = vmul.f32 -1.442695, %v4421_v61 }
 0x239   :  { %v3466_v21 = vpop.eup %3465  ;;  %3485 = vpow2.f32 %v2684_v45  ;;  %2353 = vmatprep.mubr.f32.mxu0 %v1677_v13  ;;  %v1680_v33 = vmul.f32 %v3464_v26, %v4369_v52 }
 0x23a   :  { %v3468_v32 = vpop.eup %3467  ;;  %3487 = vrcp.f32 %v1305_v20  ;;  %v1308_v39 = vadd.f32 1.0, %v3466_v21  ;;  %v4425_v6 = vpop.f32.mrb[118].mxu1 }
 0x23b   :  { %v3470_v3 = vpop.eup %3469  ;;  %v1309_v42 = vadd.f32 1.0, %v3468_v32  ;;  %3489 = vpow2.f32 %v2685_v11  ;;  %v2688_v22 = vmul.f32 -1.442695, %v4425_v6  ;;  %v4428_v1 = vpop.f32.mrb[119].mxu1 }
 0x23c   :  { %v3472_v57 = vpop.eup %3471  ;;  %3491 = vrcp.f32 %v1308_v39  ;;  %v1312_v41 = vadd.f32 1.0, %v3470_v3  ;;  %2354 = vmatmul.mubr.f32.gmra.mrb[38].mxu0 %v1676_v5  ;;  %v2689_v62 = vmul.f32 -1.442695, %v4428_v1 }
 0x23d   :  { %v3474_v37 = vpop.eup %3473  ;;  %v1681_v0 = vmul.f32 %v3472_v57, %v4373_v18  ;;  %3493 = vrcp.f32 %v1309_v42 }
 0x23e   :  { %v3476_v53 = vpop.eup %3475  ;;  %3495 = vrcp.f32 %v1312_v41  ;;  %v4433_v28 = vpop.f32.mrb[120].mxu1  ;;  %v1684_v16 = vmul.f32 %v3474_v37, %v4377_v58 }
 0x23f   :  { %v3478_v56 = vpop.eup %3477  ;;  %v1313_v34 = vadd.f32 1.0, %v3476_v53  ;;  %3497 = vpow2.f32 %v2688_v22  ;;  %2359 = vmatprep.mubr.f32.mxu0 %v1681_v0  ;;  %v2692_v54 = vmul.f32 -1.442695, %v4433_v28  ;;  %v4436_v19 = vpop.f32.mrb[121].mxu1 }
 0x240   :  { %v3480_v43 = vpop.eup %3479  ;;  %v1316_v14 = vadd.f32 1.0, %v3478_v56  ;;  %3499 = vpow2.f32 %v2689_v62  ;;  %2360 = vmatmul.mubr.f32.gmra.mrb[40].mxu0 %v1680_v33  ;;  %v2693_v18 = vmul.f32 -1.442695, %v4436_v19 }
 0x241   :  { %v3482_v25 = vpop.eup %3481  ;;  %v1685_v52 = vmul.f32 %v3480_v43, %v4380_v27  ;;  %3501 = vrcp.f32 %v1313_v34 }
 0x242   :  { %v3484_v40 = vpop.eup %3483  ;;  %3503 = vrcp.f32 %v1316_v14  ;;  %v4441_v15 = vpop.f32.mrb[122].mxu1  ;;  %v1688_v4 = vmul.f32 %v3482_v25, %v4385_v44 }
 0x243   :  { %v3486_v63 = vpop.eup %3485  ;;  %v1317_v50 = vadd.f32 1.0, %v3484_v40  ;;  %3505 = vpow2.f32 %v2692_v54  ;;  %2365 = vmatprep.mubr.f32.mxu0 %v1685_v52  ;;  %v2696_v59 = vmul.f32 -1.442695, %v4441_v15  ;;  %v4444_v31 = vpop.f32.mrb[123].mxu1 }
 0x244   :  { %v3488_v29 = vpop.eup %3487  ;;  %v1320_v10 = vadd.f32 1.0, %v3486_v63  ;;  %3507 = vpow2.f32 %v2693_v18  ;;  %2366 = vmatmul.mubr.f32.gmra.mrb[42].mxu0 %v1684_v16  ;;  %v2697_v58 = vmul.f32 -1.442695, %v4444_v31 }
 0x245   :  { %v3490_v27 = vpop.eup %3489  ;;  %v1689_v35 = vmul.f32 %v3488_v29, %v4388_v2  ;;  %3509 = vrcp.f32 %v1317_v50 }
 0x246   :  { %v3492_v23 = vpop.eup %3491  ;;  %3511 = vrcp.f32 %v1320_v10  ;;  %v1321_v55 = vadd.f32 1.0, %v3490_v27  ;;  %v4449_v17 = vpop.f32.mrb[124].mxu1 }
 0x247   :  { %v3494_v60 = vpop.eup %3493  ;;  %3513 = vpow2.f32 %v2696_v59  ;;  %2371 = vmatprep.mubr.f32.mxu0 %v1689_v35  ;;  %v2700_v30 = vmul.f32 -1.442695, %v4449_v17  ;;  %v4452_v9 = vpop.f32.mrb[125].mxu1  ;;  %v1692_v47 = vmul.f32 %v3492_v23, %v4393_v51 }
 0x248   :  { %v3496_v49 = vpop.eup %3495  ;;  %v1693_v2 = vmul.f32 %v3494_v60, %v4396_v36  ;;  %3515 = vrcp.f32 %v1321_v55  ;;  %2372 = vmatmul.mubr.f32.gmra.mrb[44].mxu0 %v1688_v4  ;;  %v2701_v46 = vmul.f32 -1.442695, %v4452_v9 }
 0x249   :  { %v3498_v12 = vpop.eup %3497  ;;  %3517 = vpow2.f32 %v2697_v58  ;;  %v1696_v3 = vmul.f32 %v3496_v49, %v4401_v48 }
 0x24a   :  { %v3500_v44 = vpop.eup %3499  ;;  %v1324_v13 = vadd.f32 1.0, %v3498_v12  ;;  %3519 = vpow2.f32 %v2700_v30  ;;  %2377 = vmatprep.mubr.f32.mxu0 %v1693_v2  ;;  %v4457_v45 = vpop.f32.mrb[126].mxu1 }
 0x24b   :  { %v3502_v26 = vpop.eup %3501  ;;  %v1325_v20 = vadd.f32 1.0, %v3500_v44  ;;  %3521 = vpow2.f32 %v2701_v46  ;;  %v2704_v11 = vmul.f32 -1.442695, %v4457_v45  ;;  %v4460_v36 = vpop.f32.mrb[127].mxu1 }
 0x24c   :  { %v3504_v21 = vpop.eup %3503  ;;  %v1697_v32 = vmul.f32 %v3502_v26, %v4405_v7  ;;  %3523 = vrcp.f32 %v1324_v13  ;;  %2378 = vmatmul.mubr.f32.gmra.mrb[46].mxu0 %v1692_v47  ;;  %v2705_v5 = vmul.f32 -1.442695, %v4460_v36 }
 0x24d   :  { %v3506_v51 = vpop.eup %3505  ;;  %3525 = vrcp.f32 %v1325_v20  ;;  %v1700_v0 = vmul.f32 %v3504_v21, %v4409_v38 }
 0x24e   :  { %v3508_v39 = vpop.eup %3507  ;;  %v1328_v42 = vadd.f32 1.0, %v3506_v51  ;;  %3527 = vpow2.f32 %v2704_v11  ;;  %2383 = vmatprep.mubr.f32.mxu0 %v1697_v32 }
 0x24f   :  { %v3510_v22 = vpop.eup %3509  ;;  %v1329_v57 = vadd.f32 1.0, %v3508_v39  ;;  %3529 = vpow2.f32 %v2705_v5 }
 0x250   :  { %v3512_v41 = vpop.eup %3511  ;;  %v1701_v62 = vmul.f32 %v3510_v22, %v4413_v24  ;;  %3531 = vrcp.f32 %v1328_v42  ;;  %2384 = vmatmul.mubr.f32.gmra.mrb[48].mxu0 %v1696_v3 }
 0x251   :  { %v3514_v7 = vpop.eup %3513  ;;  %3533 = vrcp.f32 %v1329_v57  ;;  %v1704_v14 = vmul.f32 %v3512_v41, %v4417_v8 }
 0x252   :  { %v3516_v37 = vpop.eup %3515  ;;  %v1332_v53 = vadd.f32 1.0, %v3514_v7  ;;  %2389 = vmatprep.mubr.f32.mxu0 %v1701_v62 }
 0x253   :  { %v3518_v33 = vpop.eup %3517  ;;  %v1705_v48 = vmul.f32 %v3516_v37, %v4421_v61 }
 0x254   :  { %v3520_v56 = vpop.eup %3519  ;;  %v1333_v34 = vadd.f32 1.0, %v3518_v33  ;;  %2390 = vmatmul.mubr.f32.gmra.mrb[50].mxu0 %v1700_v0  ;;  %3535 = vrcp.f32 %v1332_v53 }
 0x255   :  { %v3522_v54 = vpop.eup %3521  ;;  %v1336_v43 = vadd.f32 1.0, %v3520_v56  ;;  %2395 = vmatprep.mubr.f32.mxu0 %v1705_v48 }
 0x256   :  { %v3524_v24 = vpop.eup %3523  ;;  %3537 = vrcp.f32 %v1333_v34  ;;  %v1337_v18 = vadd.f32 1.0, %v3522_v54 }
 0x257   :  { %v3526_v25 = vpop.eup %3525  ;;  %v1708_v63 = vmul.f32 %v3524_v24, %v4425_v6 }
 0x258   :  { %v3528_v52 = vpop.eup %3527  ;;  %v1709_v38 = vmul.f32 %v3526_v25, %v4428_v1  ;;  %3539 = vrcp.f32 %v1337_v18  ;;  %2396 = vmatmul.mubr.f32.gmra.mrb[52].mxu0 %v1704_v14 }
 0x259   :  { %v3530_v40 = vpop.eup %3529  ;;  %3541 = vrcp.f32 %v1336_v43  ;;  %v1340_v61 = vadd.f32 1.0, %v3528_v52 }
 0x25a   :  { %v3532_v16 = vpop.eup %3531  ;;  %v1341_v50 = vadd.f32 1.0, %v3530_v40  ;;  %2401 = vmatprep.mubr.f32.mxu0 %v1709_v38 }
 0x25b   :  { %v3534_v59 = vpop.eup %3533  ;;  %v1712_v8 = vmul.f32 %v3532_v16, %v4433_v28 }
 0x25c   :  { %v1713_v29 = vmul.f32 %v3534_v59, %v4436_v19  ;;  %3543 = vrcp.f32 %v1341_v50  ;;  %2402 = vmatmul.mubr.f32.gmra.mrb[54].mxu0 %v1708_v63 }
 0x25d   :  { %3545 = vrcp.f32 %v1340_v61 }
 0x25e   :  { %2407 = vmatprep.mubr.f32.mxu0 %v1713_v29  ;;  %v3536_v1 = vpop.eup %3535 }
 0x25f   :  { %v1716_v58 = vmul.f32 %v3536_v1, %v4441_v15 }
 0x260   :  { %v3538_v10 = vpop.eup %3537  ;;  %2408 = vmatmul.mubr.f32.gmra.mrb[56].mxu0 %v1712_v8 }
 0x261   :  { %v1717_v27 = vmul.f32 %v3538_v10, %v4444_v31 }
 0x262   :  { %v3540_v35 = vpop.eup %3539 }
 0x263   :  { %v3542_v6 = vpop.eup %3541  ;;  %v1721_v23 = vmul.f32 %v3540_v35, %v4452_v9  ;;  %2413 = vmatprep.mubr.f32.mxu0 %v1717_v27 }
 0x264   :  { %2414 = vmatmul.mubr.f32.gmra.mrb[58].mxu0 %v1716_v58  ;;  %v1720_v4 = vmul.f32 %v3542_v6, %v4449_v17 }
 0x265   :  { %2419 = vmatprep.mubr.f32.mxu0 %v1721_v23 }
 0x266   :  { %v3544_v19 = vpop.eup %3543 }
 0x267   :  { %v3546_v55 = vpop.eup %3545  ;;  %v1725_v28 = vmul.f32 %v3544_v19, %v4460_v36 }
 0x268   :  { %2420 = vmatmul.mubr.f32.gmra.mrb[60].mxu0 %v1720_v4  ;;  %v1724_v60 = vmul.f32 %v3546_v55, %v4457_v45 }
 0x269   :  { %2425 = vmatprep.mubr.f32.mxu0 %v1725_v28 }
 0x26c   :  { %2426 = vmatmul.mubr.f32.gmra.mrb[62].mxu0 %v1724_v60 }
 0x2c3   :  { %v2241_v31 = vpop.f32.mrb[0].mxu0 }
 0x2c4   :  { %v2243_v30 = vpop.f32.mrb[1].mxu0  ;;  %2496 = vst [vmem:[#allocation8] sm:$0xff] %v2241_v31 }
 0x2c5   :  { %2497 = vst [vmem:[#allocation8 + $0x8] sm:$0xff] %v2243_v30 }
 0x2c7   :  { %v2247_v15 = vpop.f32.mrb[2].mxu0 }
 0x2c8   :  { %v2249_v9 = vpop.f32.mrb[3].mxu0  ;;  %2498 = vst [vmem:[#allocation8 + $0x10] sm:$0xff] %v2247_v15 }
 0x2c9   :  { %2499 = vst [vmem:[#allocation8 + $0x18] sm:$0xff] %v2249_v9 }
 0x2cb   :  { %v2253_v49 = vpop.f32.mrb[4].mxu0 }
 0x2cc   :  { %v2255_v2 = vpop.f32.mrb[5].mxu0  ;;  %2500 = vst [vmem:[#allocation8 + $0x20] sm:$0xff] %v2253_v49 }
 0x2cd   :  { %2501 = vst [vmem:[#allocation8 + $0x28] sm:$0xff] %v2255_v2 }
 0x2cf   :  { %v2259_v17 = vpop.f32.mrb[6].mxu0 }
 0x2d0   :  { %v2261_v46 = vpop.f32.mrb[7].mxu0  ;;  %2502 = vst [vmem:[#allocation8 + $0x30] sm:$0xff] %v2259_v17 }
 0x2d1   :  { %2503 = vst [vmem:[#allocation8 + $0x38] sm:$0xff] %v2261_v46 }
 0x2d3   :  { %v2265_v12 = vpop.f32.mrb[8].mxu0 }
 0x2d4   :  { %v2267_v44 = vpop.f32.mrb[9].mxu0  ;;  %2504 = vst [vmem:[#allocation8 + $0x40] sm:$0xff] %v2265_v12 }
 0x2d5   :  { %2505 = vst [vmem:[#allocation8 + $0x48] sm:$0xff] %v2267_v44 }
 0x2d7   :  { %v2271_v47 = vpop.f32.mrb[10].mxu0 }
 0x2d8   :  { %v2273_v13 = vpop.f32.mrb[11].mxu0  ;;  %2506 = vst [vmem:[#allocation8 + $0x50] sm:$0xff] %v2271_v47 }
 0x2d9   :  { %2507 = vst [vmem:[#allocation8 + $0x58] sm:$0xff] %v2273_v13 }
 0x2db   :  { %v2277_v45 = vpop.f32.mrb[12].mxu0 }
 0x2dc   :  { %v2279_v26 = vpop.f32.mrb[13].mxu0  ;;  %2508 = vst [vmem:[#allocation8 + $0x60] sm:$0xff] %v2277_v45 }
 0x2dd   :  { %2509 = vst [vmem:[#allocation8 + $0x68] sm:$0xff] %v2279_v26 }
 0x2df   :  { %v2283_v20 = vpop.f32.mrb[14].mxu0 }
 0x2e0   :  { %v2285_v11 = vpop.f32.mrb[15].mxu0  ;;  %2510 = vst [vmem:[#allocation8 + $0x70] sm:$0xff] %v2283_v20 }
 0x2e1   :  { %2511 = vst [vmem:[#allocation8 + $0x78] sm:$0xff] %v2285_v11 }
 0x2e3   :  { %v2289_v36 = vpop.f32.mrb[16].mxu0 }
 0x2e4   :  { %v2291_v21 = vpop.f32.mrb[17].mxu0  ;;  %2512 = vst [vmem:[#allocation8 + $0x80] sm:$0xff] %v2289_v36 }
 0x2e5   :  { %2513 = vst [vmem:[#allocation8 + $0x88] sm:$0xff] %v2291_v21 }
 0x2e7   :  { %v2295_v32 = vpop.f32.mrb[18].mxu0 }
 0x2e8   :  { %v2297_v5 = vpop.f32.mrb[19].mxu0  ;;  %2514 = vst [vmem:[#allocation8 + $0x90] sm:$0xff] %v2295_v32 }
 0x2e9   :  { %2515 = vst [vmem:[#allocation8 + $0x98] sm:$0xff] %v2297_v5 }
 0x2eb   :  { %v2301_v51 = vpop.f32.mrb[20].mxu0 }
 0x2ec   :  { %v2303_v39 = vpop.f32.mrb[21].mxu0  ;;  %2516 = vst [vmem:[#allocation8 + $0xa0] sm:$0xff] %v2301_v51 }
 0x2ed   :  { %2517 = vst [vmem:[#allocation8 + $0xa8] sm:$0xff] %v2303_v39 }
 0x2ef   :  { %v2307_v3 = vpop.f32.mrb[22].mxu0 }
 0x2f0   :  { %v2309_v42 = vpop.f32.mrb[23].mxu0  ;;  %2518 = vst [vmem:[#allocation8 + $0xb0] sm:$0xff] %v2307_v3 }
 0x2f1   :  { %2519 = vst [vmem:[#allocation8 + $0xb8] sm:$0xff] %v2309_v42 }
 0x2f3   :  { %v2313_v22 = vpop.f32.mrb[24].mxu0 }
 0x2f4   :  { %v2315_v57 = vpop.f32.mrb[25].mxu0  ;;  %2520 = vst [vmem:[#allocation8 + $0xc0] sm:$0xff] %v2313_v22 }
 0x2f5   :  { %2521 = vst [vmem:[#allocation8 + $0xc8] sm:$0xff] %v2315_v57 }
 0x2f7   :  { %v2319_v41 = vpop.f32.mrb[26].mxu0 }
 0x2f8   :  { %v2321_v62 = vpop.f32.mrb[27].mxu0  ;;  %2522 = vst [vmem:[#allocation8 + $0xd0] sm:$0xff] %v2319_v41 }
 0x2f9   :  { %2523 = vst [vmem:[#allocation8 + $0xd8] sm:$0xff] %v2321_v62 }
 0x2fb   :  { %v2325_v7 = vpop.f32.mrb[28].mxu0 }
 0x2fc   :  { %v2327_v37 = vpop.f32.mrb[29].mxu0  ;;  %2524 = vst [vmem:[#allocation8 + $0xe0] sm:$0xff] %v2325_v7 }
 0x2fd   :  { %2525 = vst [vmem:[#allocation8 + $0xe8] sm:$0xff] %v2327_v37 }
 0x2ff   :  { %v2331_v0 = vpop.f32.mrb[30].mxu0 }
 0x300   :  { %v2333_v53 = vpop.f32.mrb[31].mxu0  ;;  %2526 = vst [vmem:[#allocation8 + $0xf0] sm:$0xff] %v2331_v0 }
 0x301   :  { %2527 = vst [vmem:[#allocation8 + $0xf8] sm:$0xff] %v2333_v53 }
 0x303   :  { %v2337_v33 = vpop.f32.mrb[32].mxu0 }
 0x304   :  { %v2339_v48 = vpop.f32.mrb[33].mxu0  ;;  %2528 = vst [vmem:[#allocation8 + $0x100] sm:$0xff] %v2337_v33 }
 0x305   :  { %2529 = vst [vmem:[#allocation8 + $0x108] sm:$0xff] %v2339_v48 }
 0x307   :  { %v2343_v56 = vpop.f32.mrb[34].mxu0 }
 0x308   :  { %v2345_v34 = vpop.f32.mrb[35].mxu0  ;;  %2530 = vst [vmem:[#allocation8 + $0x110] sm:$0xff] %v2343_v56 }
 0x309   :  { %2531 = vst [vmem:[#allocation8 + $0x118] sm:$0xff] %v2345_v34 }
 0x30b   :  { %v2349_v54 = vpop.f32.mrb[36].mxu0 }
 0x30c   :  { %v2351_v43 = vpop.f32.mrb[37].mxu0  ;;  %2532 = vst [vmem:[#allocation8 + $0x120] sm:$0xff] %v2349_v54 }
 0x30d   :  { %2533 = vst [vmem:[#allocation8 + $0x128] sm:$0xff] %v2351_v43 }
 0x30f   :  { %v2355_v24 = vpop.f32.mrb[38].mxu0 }
 0x310   :  { %v2357_v14 = vpop.f32.mrb[39].mxu0  ;;  %2534 = vst [vmem:[#allocation8 + $0x130] sm:$0xff] %v2355_v24 }
 0x311   :  { %2535 = vst [vmem:[#allocation8 + $0x138] sm:$0xff] %v2357_v14 }
 0x313   :  { %v2361_v18 = vpop.f32.mrb[40].mxu0 }
 0x314   :  { %v2363_v25 = vpop.f32.mrb[41].mxu0  ;;  %2536 = vst [vmem:[#allocation8 + $0x140] sm:$0xff] %v2361_v18 }
 0x315   :  { %2537 = vst [vmem:[#allocation8 + $0x148] sm:$0xff] %v2363_v25 }
 0x317   :  { %v2367_v52 = vpop.f32.mrb[42].mxu0 }
 0x318   :  { %v2369_v38 = vpop.f32.mrb[43].mxu0  ;;  %2538 = vst [vmem:[#allocation8 + $0x150] sm:$0xff] %v2367_v52 }
 0x319   :  { %2539 = vst [vmem:[#allocation8 + $0x158] sm:$0xff] %v2369_v38 }
 0x31b   :  { %v2373_v40 = vpop.f32.mrb[44].mxu0 }
 0x31c   :  { %v2375_v61 = vpop.f32.mrb[45].mxu0  ;;  %2540 = vst [vmem:[#allocation8 + $0x160] sm:$0xff] %v2373_v40 }
 0x31d   :  { %2541 = vst [vmem:[#allocation8 + $0x168] sm:$0xff] %v2375_v61 }
 0x31f   :  { %v2379_v16 = vpop.f32.mrb[46].mxu0 }
 0x320   :  { %v2381_v63 = vpop.f32.mrb[47].mxu0  ;;  %2542 = vst [vmem:[#allocation8 + $0x170] sm:$0xff] %v2379_v16 }
 0x321   :  { %2543 = vst [vmem:[#allocation8 + $0x178] sm:$0xff] %v2381_v63 }
 0x323   :  { %v2385_v50 = vpop.f32.mrb[48].mxu0 }
 0x324   :  { %v2387_v59 = vpop.f32.mrb[49].mxu0  ;;  %2544 = vst [vmem:[#allocation8 + $0x180] sm:$0xff] %v2385_v50 }
 0x325   :  { %2545 = vst [vmem:[#allocation8 + $0x188] sm:$0xff] %v2387_v59 }
 0x327   :  { %v2391_v29 = vpop.f32.mrb[50].mxu0 }
 0x328   :  { %v2393_v8 = vpop.f32.mrb[51].mxu0  ;;  %2546 = vst [vmem:[#allocation8 + $0x190] sm:$0xff] %v2391_v29 }
 0x329   :  { %2547 = vst [vmem:[#allocation8 + $0x198] sm:$0xff] %v2393_v8 }
 0x32b   :  { %v2397_v1 = vpop.f32.mrb[52].mxu0 }
 0x32c   :  { %v2399_v10 = vpop.f32.mrb[53].mxu0  ;;  %2548 = vst [vmem:[#allocation8 + $0x1a0] sm:$0xff] %v2397_v1 }
 0x32d   :  { %2549 = vst [vmem:[#allocation8 + $0x1a8] sm:$0xff] %v2399_v10 }
 0x32f   :  { %v2403_v27 = vpop.f32.mrb[54].mxu0 }
 0x330   :  { %v2405_v35 = vpop.f32.mrb[55].mxu0  ;;  %2550 = vst [vmem:[#allocation8 + $0x1b0] sm:$0xff] %v2403_v27 }
 0x331   :  { %2551 = vst [vmem:[#allocation8 + $0x1b8] sm:$0xff] %v2405_v35 }
 0x333   :  { %v2409_v58 = vpop.f32.mrb[56].mxu0 }
 0x334   :  { %v2411_v6 = vpop.f32.mrb[57].mxu0  ;;  %2552 = vst [vmem:[#allocation8 + $0x1c0] sm:$0xff] %v2409_v58 }
 0x335   :  { %2553 = vst [vmem:[#allocation8 + $0x1c8] sm:$0xff] %v2411_v6 }
 0x337   :  { %v2415_v23 = vpop.f32.mrb[58].mxu0 }
 0x338   :  { %v2417_v19 = vpop.f32.mrb[59].mxu0  ;;  %2554 = vst [vmem:[#allocation8 + $0x1d0] sm:$0xff] %v2415_v23 }
 0x339   :  { %2555 = vst [vmem:[#allocation8 + $0x1d8] sm:$0xff] %v2417_v19 }
 0x33b   :  { %v2421_v4 = vpop.f32.mrb[60].mxu0 }
 0x33c   :  { %v2423_v55 = vpop.f32.mrb[61].mxu0  ;;  %2556 = vst [vmem:[#allocation8 + $0x1e0] sm:$0xff] %v2421_v4 }
 0x33d   :  { %2557 = vst [vmem:[#allocation8 + $0x1e8] sm:$0xff] %v2423_v55 }
 0x33f   :  { %v2427_v28 = vpop.f32.mrb[62].mxu0 }
 0x340   :  { %v2429_v60 = vpop.f32.mrb[63].mxu0  ;;  %2558 = vst [vmem:[#allocation8 + $0x1f0] sm:$0xff] %v2427_v28 }
 0x341   :  { %2559 = vst [vmem:[#allocation8 + $0x1f8] sm:$0xff] %v2429_v60 }
 0x342   :  { %3624 = shalt.err (!%p3621_p0)
}
 0x343   :  { %s3625_s27 = scalar_lea.hbm %s4497_s3, 8192 }
 0x344   :  { %p3626_p1 = scmp.ne.s32.totalorder %s4497_s3, %s3625_s27  ;;  %p3629_p2 = scmp.lt.u32.totalorder %s3625_s27, %s4497_s3 }
 0x346   :  { %p3631_p3 = pnand %p3629_p2, %p3626_p1 }
 0x348   :  { %3634 = shalt.err (!%p3631_p3)
}
 0x349   :  { %2571 = dma.vmem_to_hbm [thread:$0]  %s2566_s23, 8192, %s4497_s3, [#allocation4], %s3645_s1, %s3645_s1, %s3646_s9  }
 0x34a   :  { %3639 = dma.done.wait [#allocation4], 8192  }
 0x34b   :  { %3640 = vsyncadd [#allocation4], 4294959104 }
 0x34c   :  { %2575 = vsyncpa [#allocation3], 1 }
 0x34d   :  { %2576 = vsyncpa [#allocation6], 1 }
 0x34e   :  { %2577 = vsyncpa [#allocation4], 1 }

</bundles_post_ra>
